<compile_context>
chip_gen: v7x
topology: tpu7x:2x2x1
jax: 0.10.0
libtpu: 0.0.40
codegen_flags: <defaults>
</compile_context>

<pallas_src>
import math
import functools

import jax
import jax.numpy as jnp
from jax import lax
from jax.experimental import pallas as pl
from jax.experimental.pallas import tpu as pltpu  # noqa: F401  (TPU backend)

# ------------------------- small config (consistent with hpGPT.forward) -----
BLOCK_SIZE = 8      # T
N_EMBD = 32         # C
N_HEAD = 4          # H
VOCAB_SIZE = 512    # V
N_LAYERS = 2
BATCH = 2
LN_EPS = 1e-5       # PyTorch nn.LayerNorm default eps
NEG_BIG = -1e30     # finite mask value

# packed per-layer weight buffer layout (rows x 128 lanes, all blocks 8-row aligned)
PACK_LANES = 128
ROWS_PER_LAYER = 5 * N_EMBD + 8          # 168 rows/layer
assert 3 * N_EMBD <= PACK_LANES


# ------------------------------ shared math helpers --------------------------
def _layernorm(x, g, b):
    mu = jnp.mean(x, axis=-1, keepdims=True)
    xc = x - mu
    var = jnp.mean(xc * xc, axis=-1, keepdims=True)
    return xc * lax.rsqrt(var + LN_EPS) * g + b


def _gelu_tanh(x):
    # matches torch.nn.GELU(approximate='tanh')
    c = math.sqrt(2.0 / math.pi)
    return 0.5 * x * (1.0 + jnp.tanh(c * (x + 0.044715 * x * x * x)))


# ------------------------------ fused full-forward kernel --------------------
def gpt_kernel(idx_ref, emb_ref, lyr_ref, head_ref, o_ref, *,
               n_layer, n_head, batch, seq, n_embd, vocab):
    B, T, C, H, V = batch, seq, n_embd, n_head, vocab
    BT = B * T
    dh = C // H
    R = ROWS_PER_LAYER

    # ---- embeddings: one-hot token gather (single MXU matmul) + tiled pos rows ----
    tok = idx_ref[...]                                                   # (BT,1) i32
    onehot = (lax.broadcasted_iota(jnp.int32, (BT, V), 1) == tok).astype(jnp.float32)
    x = jnp.dot(onehot, emb_ref[0:V, :], preferred_element_type=jnp.float32)  # (BT,C)
    wpe = emb_ref[V:V + T, :]                                            # (T,C)
    x = x + jnp.concatenate([wpe] * B, axis=0)                           # pos emb

    # additive causal mask built ONCE, reused across all layers / heads
    r_idx = lax.broadcasted_iota(jnp.int32, (T, T), 0)
    c_idx = lax.broadcasted_iota(jnp.int32, (T, T), 1)
    causal_add = jnp.where(c_idx <= r_idx, 0.0, NEG_BIG).astype(jnp.float32)

    for l in range(n_layer):                                             # static unroll
        base = l * R
        # static-offset slices of the single packed layer buffer
        wqkv = lyr_ref[base + 0 * C:base + 1 * C, 0:3 * C]   # (C,3C)  Q pre-scaled
        wpj  = lyr_ref[base + 1 * C:base + 2 * C, 0:C]       # (C,C)
        w1   = lyr_ref[base + 2 * C:base + 3 * C, 0:2 * C]   # (C,2C)
        w2   = lyr_ref[base + 3 * C:base + 5 * C, 0:C]       # (2C,C)
        vrow = base + 5 * C
        bqkv = lyr_ref[vrow + 0:vrow + 1, 0:3 * C]
        bpj  = lyr_ref[vrow + 1:vrow + 2, 0:C]
        g1   = lyr_ref[vrow + 2:vrow + 3, 0:C]
        be1  = lyr_ref[vrow + 3:vrow + 4, 0:C]
        b1   = lyr_ref[vrow + 4:vrow + 5, 0:2 * C]
        b2   = lyr_ref[vrow + 5:vrow + 6, 0:C]
        g2   = lyr_ref[vrow + 6:vrow + 7, 0:C]
        be2  = lyr_ref[vrow + 7:vrow + 8, 0:C]

        # ----- MHA (1/sqrt(dh) already folded into the Q columns) -----
        qkv = jnp.dot(x, wqkv, preferred_element_type=jnp.float32) + bqkv    # (BT,3C)

        def split_heads(off):
            # (BT, C) lane range -> (H*B, T, dh): heads merged into ONE batch dim
            return jnp.concatenate(
                [qkv[:, off + h * dh: off + (h + 1) * dh].reshape(B, T, dh)
                 for h in range(H)], axis=0)

        qh = split_heads(0)
        kh = split_heads(C)
        vh = split_heads(2 * C)

        # ONE batched scores dot_general + ONE softmax + ONE batched p@v
        att = lax.dot_general(qh, kh, (((2,), (2,)), ((0,), (0,))),
                              preferred_element_type=jnp.float32)            # (HB,T,T)
        att = att + causal_add
        att = att - jnp.max(att, axis=-1, keepdims=True)
        p = jnp.exp(att)
        p = p / jnp.sum(p, axis=-1, keepdims=True)       # exact divide (tolerance)
        oh = lax.dot_general(p, vh, (((2,), (1,)), ((0,), (0,))),
                             preferred_element_type=jnp.float32)             # (HB,T,dh)

        # reassemble head-concat layout and do ONE projection matmul (+ bias init)
        y = jnp.concatenate([oh[h * B:(h + 1) * B].reshape(BT, dh)
                             for h in range(H)], axis=-1)                    # (BT,C)
        y = jnp.dot(y, wpj, preferred_element_type=jnp.float32) + bpj

        # x = x + ln_1(mha(x))   (post-sublayer LN, as in the module)
        x = x + _layernorm(y, g1, be1)

        # ----- MLP -----
        hid = jnp.dot(x, w1, preferred_element_type=jnp.float32) + b1
        hid = _gelu_tanh(hid)
        hid = jnp.dot(hid, w2, preferred_element_type=jnp.float32) + b2

        # x = x + ln_2(mlp(x))
        x = x + _layernorm(hid, g2, be2)

    # ----- epilogue: ln_f gamma folded into w_lm rows, beta@w_lm is a (1,V) bias -----
    mu = jnp.mean(x, axis=-1, keepdims=True)
    xc = x - mu
    var = jnp.mean(xc * xc, axis=-1, keepdims=True)
    xhat = xc * lax.rsqrt(var + LN_EPS)
    logits = jnp.dot(xhat, head_ref[0:C, :],
                     preferred_element_type=jnp.float32) + head_ref[C:C + 1, :]
    o_ref[...] = logits.reshape(o_ref.shape)        # single lane-dense HBM write


# ------------------------------ pallas_call wrapper ---------------------------
@jax.jit
def hpgpt_forward(packed, idx):
    B, T = idx.shape
    V = packed["head"].shape[1]
    n_layer = packed["layers"].shape[0] // ROWS_PER_LAYER
    idx_col = idx.reshape(B * T, 1).astype(jnp.int32)

    kernel = functools.partial(gpt_kernel, n_layer=n_layer, n_head=N_HEAD,
                               batch=B, seq=T, n_embd=N_EMBD, vocab=V)

    # No grid: one invocation handles the whole (tiny) batch; 4 input DMAs + 1 output.
    logits = pl.pallas_call(
        kernel,
        out_shape=jax.ShapeDtypeStruct((B, T, V), jnp.float32),
    )(idx_col, packed["emb"], packed["layers"], packed["head"])
    # TODO(synk): cross-entropy loss (targets path) and generate() top-k sampling
    #             are not kernelized.
    return logits, None


# ------------------------------ parameter construction ------------------------
def init_params(key):
    C, V, T, L = N_EMBD, VOCAB_SIZE, BLOCK_SIZE, N_LAYERS
    ks = jax.random.split(key, L + 3)
    p = {}
    p["wte"] = jax.random.normal(ks[0], (V, C), jnp.float32) * 0.02
    p["wpe"] = jax.random.normal(ks[1], (T, C), jnp.float32) * 0.02
    p["layers"] = []
    for l in range(L):
        kq, kp_, k1, k2, kb1, kb2 = jax.random.split(ks[2 + l], 6)
        layer = (
            jax.random.normal(kq, (C, 3 * C), jnp.float32) * 0.02,   # W_qkv (in,out)
            jax.random.normal(kb1, (1, 3 * C), jnp.float32) * 0.02,  # b_qkv
            jax.random.normal(kp_, (C, C), jnp.float32) * 0.02,      # W_proj
            jax.random.normal(kb2, (1, C), jnp.float32) * 0.02,      # b_proj
            jnp.ones((1, C), jnp.float32),                           # ln_1 gamma
            jnp.zeros((1, C), jnp.float32),                          # ln_1 beta
            jax.random.normal(k1, (C, 2 * C), jnp.float32) * 0.02,   # mlp W1
            jnp.zeros((1, 2 * C), jnp.float32),                      # mlp b1
            jax.random.normal(k2, (2 * C, C), jnp.float32) * 0.02,   # mlp W2
            jnp.zeros((1, C), jnp.float32),                          # mlp b2
            jnp.ones((1, C), jnp.float32),                           # ln_2 gamma
            jnp.zeros((1, C), jnp.float32),                          # ln_2 beta
        )
        p["layers"].append(layer)
    p["ln_f_g"] = jnp.ones((1, C), jnp.float32)
    p["ln_f_b"] = jnp.zeros((1, C), jnp.float32)
    p["w_lm"] = jax.random.normal(ks[-1], (C, V), jnp.float32) * 0.02
    return p


def pack_params(params):
    """One-time weight transform: fold 1/sqrt(dh) into Q columns, fold ln_f into
    lm_head, and pack everything into 3 contiguous f32 buffers (emb / layers / head)."""
    C, V, T = N_EMBD, VOCAB_SIZE, BLOCK_SIZE
    dh = C // N_HEAD
    qscale = jnp.concatenate([jnp.full((C,), 1.0 / math.sqrt(dh), jnp.float32),
                              jnp.ones((2 * C,), jnp.float32)])

    bufs = []
    for (wqkv, bqkv, wpj, bpj, g1, be1, w1, b1, w2, b2, g2, be2) in params["layers"]:
        buf = jnp.zeros((ROWS_PER_LAYER, PACK_LANES), jnp.float32)
        buf = buf.at[0 * C:1 * C, 0:3 * C].set(wqkv * qscale[None, :])
        buf = buf.at[1 * C:2 * C, 0:C].set(wpj)
        buf = buf.at[2 * C:3 * C, 0:2 * C].set(w1)
        buf = buf.at[3 * C:5 * C, 0:C].set(w2)
        r = 5 * C
        buf = buf.at[r + 0, 0:3 * C].set(bqkv[0] * qscale)
        buf = buf.at[r + 1, 0:C].set(bpj[0])
        buf = buf.at[r + 2, 0:C].set(g1[0])
        buf = buf.at[r + 3, 0:C].set(be1[0])
        buf = buf.at[r + 4, 0:2 * C].set(b1[0])
        buf = buf.at[r + 5, 0:C].set(b2[0])
        buf = buf.at[r + 6, 0:C].set(g2[0])
        buf = buf.at[r + 7, 0:C].set(be2[0])
        bufs.append(buf)
    layers_packed = jnp.concatenate(bufs, axis=0)                     # (L*168, 128)

    emb_packed = jnp.concatenate([params["wte"], params["wpe"]], axis=0)   # (V+T, C)

    g = params["ln_f_g"][0]
    b = params["ln_f_b"][0]
    head_packed = jnp.concatenate([params["w_lm"] * g[:, None],
                                   (b @ params["w_lm"])[None, :]], axis=0)  # (C+1, V)
    return {"emb": emb_packed, "layers": layers_packed, "head": head_packed}


# ------------------------------ pure-JAX reference ----------------------------
def hpgpt_reference(params, idx):
    B, T = idx.shape
    C, H = N_EMBD, N_HEAD
    dh = C // H
    x = params["wte"][idx] + params["wpe"][jnp.arange(T)][None, :, :]
    causal = jnp.tril(jnp.ones((T, T), bool))
    for (wqkv, bqkv, wpj, bpj, g1, be1, w1, b1, w2, b2, g2, be2) in params["layers"]:
        qkv = x @ wqkv + bqkv[0]
        q, k, v = jnp.split(qkv, 3, axis=-1)
        q = q.reshape(B, T, H, dh).transpose(0, 2, 1, 3)
        k = k.reshape(B, T, H, dh).transpose(0, 2, 1, 3)
        v = v.reshape(B, T, H, dh).transpose(0, 2, 1, 3)
        att = (q @ k.transpose(0, 1, 3, 2)) / math.sqrt(dh)
        att = jnp.where(causal[None, None], att, -jnp.inf)
        att = jax.nn.softmax(att, axis=-1)
        y = (att @ v).transpose(0, 2, 1, 3).reshape(B, T, C)
        y = y @ wpj + bpj[0]
        x = x + _layernorm(y, g1[0], be1[0])
        h = _gelu_tanh(x @ w1 + b1[0])
        h = h @ w2 + b2[0]
        x = x + _layernorm(h, g2[0], be2[0])
    x = _layernorm(x, params["ln_f_g"][0], params["ln_f_b"][0])
    return x @ params["w_lm"]


# ------------------------------ main ------------------------------------------
if __name__ == "__main__":
    key = jax.random.PRNGKey(0)
    kp, kidx = jax.random.split(key)
    params = init_params(kp)
    packed = pack_params(params)
    idx = jax.random.randint(kidx, (BATCH, BLOCK_SIZE), 0, VOCAB_SIZE, dtype=jnp.int32)

    logits, loss = hpgpt_forward(packed, idx)
    logits = jax.block_until_ready(logits)
    assert logits.shape == (BATCH, BLOCK_SIZE, VOCAB_SIZE)

    ref = jax.block_until_ready(hpgpt_reference(params, idx))
    assert jnp.allclose(logits, ref, rtol=1e-4, atol=1e-4), "mismatch vs reference"

    print("KERNEL_OK")
</pallas_src>

<mosaic_0001>
module attributes {stable_mosaic.version = 11 : i64} {
  func.func @gpt_kernel(%arg0: memref<16x1xi32, #tpu.memory_space<vmem>>, %arg1: memref<520x32xf32, #tpu.memory_space<vmem>>, %arg2: memref<336x128xf32, #tpu.memory_space<vmem>>, %arg3: memref<33x512xf32, #tpu.memory_space<vmem>>, %arg4: memref<2x8x512xf32, #tpu.memory_space<vmem>>) attributes {dimension_semantics = [], scalar_prefetch = 0 : i64, scratch_operands = 0 : i64, tpu.core_type = #tpu.core_type<tc>} {
    %c0 = arith.constant 0 : index
    %c0_0 = arith.constant 0 : index
    %0 = vector.load %arg0[%c0, %c0_0] : memref<16x1xi32, #tpu.memory_space<vmem>>, vector<16x1xi32>
    %1 = tpu.iota {dimensions = array<i32: 1>} : vector<16x512xi32>
    %2 = vector.broadcast %0 : vector<16x1xi32> to vector<16x512xi32>
    %3 = arith.cmpi eq, %1, %2 : vector<16x512xi32>
    %4 = arith.extui %3 : vector<16x512xi1> to vector<16x512xi32>
    %5 = arith.sitofp %4 : vector<16x512xi32> to vector<16x512xf32>
    %c0_1 = arith.constant 0 : index
    %c0_2 = arith.constant 0 : index
    %6 = vector.load %arg1[%c0_1, %c0_2] : memref<520x32xf32, #tpu.memory_space<vmem>>, vector<512x32xf32>
    %cst = arith.constant dense<0.000000e+00> : vector<16x32xf32>
    %7 = tpu.matmul %5, %6, %cst {dimension_numbers = #tpu.dot_dimension_numbers<[1], [0], [0], [1], [0, 0, 1, 1], [], []>} : vector<16x512xf32>, vector<512x32xf32>, vector<16x32xf32> -> vector<16x32xf32>
    %c512 = arith.constant 512 : index
    %c0_3 = arith.constant 0 : index
    %8 = vector.load %arg1[%c512, %c0_3] : memref<520x32xf32, #tpu.memory_space<vmem>>, vector<8x32xf32>
    %9 = tpu.concatenate %8, %8 in 0 : vector<8x32xf32>, vector<8x32xf32> -> vector<16x32xf32>
    %10 = arith.addf %7, %9 : vector<16x32xf32>
    %11 = tpu.iota {dimensions = array<i32: 0>} : vector<8x8xi32>
    %12 = tpu.iota {dimensions = array<i32: 1>} : vector<8x8xi32>
    %13 = arith.cmpi sle, %12, %11 : vector<8x8xi32>
    %cst_4 = arith.constant 0.000000e+00 : f32
    %cst_5 = arith.constant -1.000000e+30 : f32
    %14 = vector.broadcast %cst_4 : f32 to vector<8x8xf32>
    %15 = vector.broadcast %cst_5 : f32 to vector<8x8xf32>
    %16 = arith.select %13, %14, %15 : vector<8x8xi1>, vector<8x8xf32>
    %c0_6 = arith.constant 0 : index
    %c0_7 = arith.constant 0 : index
    %17 = vector.load %arg2[%c0_6, %c0_7] : memref<336x128xf32, #tpu.memory_space<vmem>>, vector<32x96xf32>
    %c32 = arith.constant 32 : index
    %c0_8 = arith.constant 0 : index
    %18 = vector.load %arg2[%c32, %c0_8] : memref<336x128xf32, #tpu.memory_space<vmem>>, vector<32x32xf32>
    %c64 = arith.constant 64 : index
    %c0_9 = arith.constant 0 : index
    %19 = vector.load %arg2[%c64, %c0_9] : memref<336x128xf32, #tpu.memory_space<vmem>>, vector<32x64xf32>
    %c96 = arith.constant 96 : index
    %c0_10 = arith.constant 0 : index
    %20 = vector.load %arg2[%c96, %c0_10] : memref<336x128xf32, #tpu.memory_space<vmem>>, vector<64x32xf32>
    %c160 = arith.constant 160 : index
    %c0_11 = arith.constant 0 : index
    %21 = vector.load %arg2[%c160, %c0_11] : memref<336x128xf32, #tpu.memory_space<vmem>>, vector<1x96xf32>
    %c161 = arith.constant 161 : index
    %c0_12 = arith.constant 0 : index
    %22 = vector.load %arg2[%c161, %c0_12] : memref<336x128xf32, #tpu.memory_space<vmem>>, vector<1x32xf32>
    %c162 = arith.constant 162 : index
    %c0_13 = arith.constant 0 : index
    %23 = vector.load %arg2[%c162, %c0_13] : memref<336x128xf32, #tpu.memory_space<vmem>>, vector<1x32xf32>
    %c163 = arith.constant 163 : index
    %c0_14 = arith.constant 0 : index
    %24 = vector.load %arg2[%c163, %c0_14] : memref<336x128xf32, #tpu.memory_space<vmem>>, vector<1x32xf32>
    %c164 = arith.constant 164 : index
    %c0_15 = arith.constant 0 : index
    %25 = vector.load %arg2[%c164, %c0_15] : memref<336x128xf32, #tpu.memory_space<vmem>>, vector<1x64xf32>
    %c165 = arith.constant 165 : index
    %c0_16 = arith.constant 0 : index
    %26 = vector.load %arg2[%c165, %c0_16] : memref<336x128xf32, #tpu.memory_space<vmem>>, vector<1x32xf32>
    %c166 = arith.constant 166 : index
    %c0_17 = arith.constant 0 : index
    %27 = vector.load %arg2[%c166, %c0_17] : memref<336x128xf32, #tpu.memory_space<vmem>>, vector<1x32xf32>
    %c167 = arith.constant 167 : index
    %c0_18 = arith.constant 0 : index
    %28 = vector.load %arg2[%c167, %c0_18] : memref<336x128xf32, #tpu.memory_space<vmem>>, vector<1x32xf32>
    %cst_19 = arith.constant dense<0.000000e+00> : vector<16x96xf32>
    %29 = tpu.matmul %10, %17, %cst_19 {dimension_numbers = #tpu.dot_dimension_numbers<[1], [0], [0], [1], [0, 0, 1, 1], [], []>} : vector<16x32xf32>, vector<32x96xf32>, vector<16x96xf32> -> vector<16x96xf32>
    %30 = vector.broadcast %21 : vector<1x96xf32> to vector<16x96xf32>
    %31 = arith.addf %29, %30 : vector<16x96xf32>
    %32 = vector.extract_strided_slice %31 {offsets = [0, 0], sizes = [16, 8], strides = [1, 1]} : vector<16x96xf32> to vector<16x8xf32>
    %33 = vector.shape_cast %32 : vector<16x8xf32> to vector<2x8x8xf32>
    %34 = vector.extract_strided_slice %31 {offsets = [0, 8], sizes = [16, 8], strides = [1, 1]} : vector<16x96xf32> to vector<16x8xf32>
    %35 = vector.shape_cast %34 : vector<16x8xf32> to vector<2x8x8xf32>
    %36 = vector.extract_strided_slice %31 {offsets = [0, 16], sizes = [16, 8], strides = [1, 1]} : vector<16x96xf32> to vector<16x8xf32>
    %37 = vector.shape_cast %36 : vector<16x8xf32> to vector<2x8x8xf32>
    %38 = vector.extract_strided_slice %31 {offsets = [0, 24], sizes = [16, 8], strides = [1, 1]} : vector<16x96xf32> to vector<16x8xf32>
    %39 = vector.shape_cast %38 : vector<16x8xf32> to vector<2x8x8xf32>
    %40 = tpu.concatenate %33, %35, %37, %39 in 0 : vector<2x8x8xf32>, vector<2x8x8xf32>, vector<2x8x8xf32>, vector<2x8x8xf32> -> vector<8x8x8xf32>
    %41 = vector.extract_strided_slice %31 {offsets = [0, 32], sizes = [16, 8], strides = [1, 1]} : vector<16x96xf32> to vector<16x8xf32>
    %42 = vector.shape_cast %41 : vector<16x8xf32> to vector<2x8x8xf32>
    %43 = vector.extract_strided_slice %31 {offsets = [0, 40], sizes = [16, 8], strides = [1, 1]} : vector<16x96xf32> to vector<16x8xf32>
    %44 = vector.shape_cast %43 : vector<16x8xf32> to vector<2x8x8xf32>
    %45 = vector.extract_strided_slice %31 {offsets = [0, 48], sizes = [16, 8], strides = [1, 1]} : vector<16x96xf32> to vector<16x8xf32>
    %46 = vector.shape_cast %45 : vector<16x8xf32> to vector<2x8x8xf32>
    %47 = vector.extract_strided_slice %31 {offsets = [0, 56], sizes = [16, 8], strides = [1, 1]} : vector<16x96xf32> to vector<16x8xf32>
    %48 = vector.shape_cast %47 : vector<16x8xf32> to vector<2x8x8xf32>
    %49 = tpu.concatenate %42, %44, %46, %48 in 0 : vector<2x8x8xf32>, vector<2x8x8xf32>, vector<2x8x8xf32>, vector<2x8x8xf32> -> vector<8x8x8xf32>
    %50 = vector.extract_strided_slice %31 {offsets = [0, 64], sizes = [16, 8], strides = [1, 1]} : vector<16x96xf32> to vector<16x8xf32>
    %51 = vector.shape_cast %50 : vector<16x8xf32> to vector<2x8x8xf32>
    %52 = vector.extract_strided_slice %31 {offsets = [0, 72], sizes = [16, 8], strides = [1, 1]} : vector<16x96xf32> to vector<16x8xf32>
    %53 = vector.shape_cast %52 : vector<16x8xf32> to vector<2x8x8xf32>
    %54 = vector.extract_strided_slice %31 {offsets = [0, 80], sizes = [16, 8], strides = [1, 1]} : vector<16x96xf32> to vector<16x8xf32>
    %55 = vector.shape_cast %54 : vector<16x8xf32> to vector<2x8x8xf32>
    %56 = vector.extract_strided_slice %31 {offsets = [0, 88], sizes = [16, 8], strides = [1, 1]} : vector<16x96xf32> to vector<16x8xf32>
    %57 = vector.shape_cast %56 : vector<16x8xf32> to vector<2x8x8xf32>
    %58 = tpu.concatenate %51, %53, %55, %57 in 0 : vector<2x8x8xf32>, vector<2x8x8xf32>, vector<2x8x8xf32>, vector<2x8x8xf32> -> vector<8x8x8xf32>
    %cst_20 = arith.constant dense<0.000000e+00> : vector<8x8x8xf32>
    %59 = tpu.matmul %40, %49, %cst_20 {dimension_numbers = #tpu.dot_dimension_numbers<[2], [2], [1], [1], [0, 0, 0, 1, 1, 1], [0], [0]>} : vector<8x8x8xf32>, vector<8x8x8xf32>, vector<8x8x8xf32> -> vector<8x8x8xf32>
    %60 = vector.shape_cast %16 : vector<8x8xf32> to vector<1x8x8xf32>
    %61 = vector.broadcast %60 : vector<1x8x8xf32> to vector<8x8x8xf32>
    %62 = arith.addf %59, %61 : vector<8x8x8xf32>
    %cst_21 = arith.constant dense<0xFF800000> : vector<8x8xf32>
    %63 = vector.multi_reduction <maximumf>, %62, %cst_21 [2] : vector<8x8x8xf32> to vector<8x8xf32>
    %64 = vector.shape_cast %63 : vector<8x8xf32> to vector<8x8x1xf32>
    %65 = vector.broadcast %64 : vector<8x8x1xf32> to vector<8x8x8xf32>
    %66 = arith.subf %62, %65 : vector<8x8x8xf32>
    %67 = math.exp %66 : vector<8x8x8xf32>
    %cst_22 = arith.constant dense<0.000000e+00> : vector<8x8xf32>
    %68 = vector.multi_reduction <add>, %67, %cst_22 [2] : vector<8x8x8xf32> to vector<8x8xf32>
    %69 = vector.shape_cast %68 : vector<8x8xf32> to vector<8x8x1xf32>
    %70 = vector.broadcast %69 : vector<8x8x1xf32> to vector<8x8x8xf32>
    %71 = arith.divf %67, %70 : vector<8x8x8xf32>
    %cst_23 = arith.constant dense<0.000000e+00> : vector<8x8x8xf32>
    %72 = tpu.matmul %71, %58, %cst_23 {dimension_numbers = #tpu.dot_dimension_numbers<[2], [1], [1], [2], [0, 0, 0, 1, 1, 2], [0], [0]>} : vector<8x8x8xf32>, vector<8x8x8xf32>, vector<8x8x8xf32> -> vector<8x8x8xf32>
    %73 = vector.extract_strided_slice %72 {offsets = [0, 0, 0], sizes = [2, 8, 8], strides = [1, 1, 1]} : vector<8x8x8xf32> to vector<2x8x8xf32>
    %74 = vector.shape_cast %73 : vector<2x8x8xf32> to vector<16x8xf32>
    %75 = vector.extract_strided_slice %72 {offsets = [2, 0, 0], sizes = [2, 8, 8], strides = [1, 1, 1]} : vector<8x8x8xf32> to vector<2x8x8xf32>
    %76 = vector.shape_cast %75 : vector<2x8x8xf32> to vector<16x8xf32>
    %77 = vector.extract_strided_slice %72 {offsets = [4, 0, 0], sizes = [2, 8, 8], strides = [1, 1, 1]} : vector<8x8x8xf32> to vector<2x8x8xf32>
    %78 = vector.shape_cast %77 : vector<2x8x8xf32> to vector<16x8xf32>
    %79 = vector.extract_strided_slice %72 {offsets = [6, 0, 0], sizes = [2, 8, 8], strides = [1, 1, 1]} : vector<8x8x8xf32> to vector<2x8x8xf32>
    %80 = vector.shape_cast %79 : vector<2x8x8xf32> to vector<16x8xf32>
    %81 = tpu.concatenate %74, %76, %78, %80 in 1 : vector<16x8xf32>, vector<16x8xf32>, vector<16x8xf32>, vector<16x8xf32> -> vector<16x32xf32>
    %cst_24 = arith.constant dense<0.000000e+00> : vector<16x32xf32>
    %82 = tpu.matmul %81, %18, %cst_24 {dimension_numbers = #tpu.dot_dimension_numbers<[1], [0], [0], [1], [0, 0, 1, 1], [], []>} : vector<16x32xf32>, vector<32x32xf32>, vector<16x32xf32> -> vector<16x32xf32>
    %83 = vector.broadcast %22 : vector<1x32xf32> to vector<16x32xf32>
    %84 = arith.addf %82, %83 : vector<16x32xf32>
    %cst_25 = arith.constant dense<0.000000e+00> : vector<16xf32>
    %85 = vector.multi_reduction <add>, %84, %cst_25 [1] : vector<16x32xf32> to vector<16xf32>
    %86 = vector.shape_cast %85 : vector<16xf32> to vector<16x1xf32>
    %cst_26 = arith.constant 3.200000e+01 : f32
    %87 = vector.broadcast %cst_26 : f32 to vector<16x1xf32>
    %88 = arith.divf %86, %87 : vector<16x1xf32>
    %89 = vector.broadcast %88 : vector<16x1xf32> to vector<16x32xf32>
    %90 = arith.subf %84, %89 : vector<16x32xf32>
    %91 = arith.mulf %90, %90 : vector<16x32xf32>
    %cst_27 = arith.constant dense<0.000000e+00> : vector<16xf32>
    %92 = vector.multi_reduction <add>, %91, %cst_27 [1] : vector<16x32xf32> to vector<16xf32>
    %93 = vector.shape_cast %92 : vector<16xf32> to vector<16x1xf32>
    %cst_28 = arith.constant 3.200000e+01 : f32
    %94 = vector.broadcast %cst_28 : f32 to vector<16x1xf32>
    %95 = arith.divf %93, %94 : vector<16x1xf32>
    %cst_29 = arith.constant 9.99999974E-6 : f32
    %96 = vector.broadcast %cst_29 : f32 to vector<16x1xf32>
    %97 = arith.addf %95, %96 : vector<16x1xf32>
    %98 = math.rsqrt %97 : vector<16x1xf32>
    %99 = vector.broadcast %98 : vector<16x1xf32> to vector<16x32xf32>
    %100 = arith.mulf %90, %99 : vector<16x32xf32>
    %101 = vector.broadcast %23 : vector<1x32xf32> to vector<16x32xf32>
    %102 = arith.mulf %100, %101 : vector<16x32xf32>
    %103 = vector.broadcast %24 : vector<1x32xf32> to vector<16x32xf32>
    %104 = arith.addf %102, %103 : vector<16x32xf32>
    %105 = arith.addf %10, %104 : vector<16x32xf32>
    %cst_30 = arith.constant dense<0.000000e+00> : vector<16x64xf32>
    %106 = tpu.matmul %105, %19, %cst_30 {dimension_numbers = #tpu.dot_dimension_numbers<[1], [0], [0], [1], [0, 0, 1, 1], [], []>} : vector<16x32xf32>, vector<32x64xf32>, vector<16x64xf32> -> vector<16x64xf32>
    %107 = vector.broadcast %25 : vector<1x64xf32> to vector<16x64xf32>
    %108 = arith.addf %106, %107 : vector<16x64xf32>
    %cst_31 = arith.constant 5.000000e-01 : f32
    %109 = vector.broadcast %cst_31 : f32 to vector<16x64xf32>
    %110 = arith.mulf %109, %108 : vector<16x64xf32>
    %cst_32 = arith.constant 4.471500e-02 : f32
    %111 = vector.broadcast %cst_32 : f32 to vector<16x64xf32>
    %112 = arith.mulf %111, %108 : vector<16x64xf32>
    %113 = arith.mulf %112, %108 : vector<16x64xf32>
    %114 = arith.mulf %113, %108 : vector<16x64xf32>
    %115 = arith.addf %108, %114 : vector<16x64xf32>
    %cst_33 = arith.constant 0.797884583 : f32
    %116 = vector.broadcast %cst_33 : f32 to vector<16x64xf32>
    %117 = arith.mulf %116, %115 : vector<16x64xf32>
    %118 = math.tanh %117 : vector<16x64xf32>
    %cst_34 = arith.constant 1.000000e+00 : f32
    %119 = vector.broadcast %cst_34 : f32 to vector<16x64xf32>
    %120 = arith.addf %119, %118 : vector<16x64xf32>
    %121 = arith.mulf %110, %120 : vector<16x64xf32>
    %cst_35 = arith.constant dense<0.000000e+00> : vector<16x32xf32>
    %122 = tpu.matmul %121, %20, %cst_35 {dimension_numbers = #tpu.dot_dimension_numbers<[1], [0], [0], [1], [0, 0, 1, 1], [], []>} : vector<16x64xf32>, vector<64x32xf32>, vector<16x32xf32> -> vector<16x32xf32>
    %123 = vector.broadcast %26 : vector<1x32xf32> to vector<16x32xf32>
    %124 = arith.addf %122, %123 : vector<16x32xf32>
    %cst_36 = arith.constant dense<0.000000e+00> : vector<16xf32>
    %125 = vector.multi_reduction <add>, %124, %cst_36 [1] : vector<16x32xf32> to vector<16xf32>
    %126 = vector.shape_cast %125 : vector<16xf32> to vector<16x1xf32>
    %cst_37 = arith.constant 3.200000e+01 : f32
    %127 = vector.broadcast %cst_37 : f32 to vector<16x1xf32>
    %128 = arith.divf %126, %127 : vector<16x1xf32>
    %129 = vector.broadcast %128 : vector<16x1xf32> to vector<16x32xf32>
    %130 = arith.subf %124, %129 : vector<16x32xf32>
    %131 = arith.mulf %130, %130 : vector<16x32xf32>
    %cst_38 = arith.constant dense<0.000000e+00> : vector<16xf32>
    %132 = vector.multi_reduction <add>, %131, %cst_38 [1] : vector<16x32xf32> to vector<16xf32>
    %133 = vector.shape_cast %132 : vector<16xf32> to vector<16x1xf32>
    %cst_39 = arith.constant 3.200000e+01 : f32
    %134 = vector.broadcast %cst_39 : f32 to vector<16x1xf32>
    %135 = arith.divf %133, %134 : vector<16x1xf32>
    %cst_40 = arith.constant 9.99999974E-6 : f32
    %136 = vector.broadcast %cst_40 : f32 to vector<16x1xf32>
    %137 = arith.addf %135, %136 : vector<16x1xf32>
    %138 = math.rsqrt %137 : vector<16x1xf32>
    %139 = vector.broadcast %138 : vector<16x1xf32> to vector<16x32xf32>
    %140 = arith.mulf %130, %139 : vector<16x32xf32>
    %141 = vector.broadcast %27 : vector<1x32xf32> to vector<16x32xf32>
    %142 = arith.mulf %140, %141 : vector<16x32xf32>
    %143 = vector.broadcast %28 : vector<1x32xf32> to vector<16x32xf32>
    %144 = arith.addf %142, %143 : vector<16x32xf32>
    %145 = arith.addf %105, %144 : vector<16x32xf32>
    %c168 = arith.constant 168 : index
    %c0_41 = arith.constant 0 : index
    %146 = vector.load %arg2[%c168, %c0_41] : memref<336x128xf32, #tpu.memory_space<vmem>>, vector<32x96xf32>
    %c200 = arith.constant 200 : index
    %c0_42 = arith.constant 0 : index
    %147 = vector.load %arg2[%c200, %c0_42] : memref<336x128xf32, #tpu.memory_space<vmem>>, vector<32x32xf32>
    %c232 = arith.constant 232 : index
    %c0_43 = arith.constant 0 : index
    %148 = vector.load %arg2[%c232, %c0_43] : memref<336x128xf32, #tpu.memory_space<vmem>>, vector<32x64xf32>
    %c264 = arith.constant 264 : index
    %c0_44 = arith.constant 0 : index
    %149 = vector.load %arg2[%c264, %c0_44] : memref<336x128xf32, #tpu.memory_space<vmem>>, vector<64x32xf32>
    %c328 = arith.constant 328 : index
    %c0_45 = arith.constant 0 : index
    %150 = vector.load %arg2[%c328, %c0_45] : memref<336x128xf32, #tpu.memory_space<vmem>>, vector<1x96xf32>
    %c329 = arith.constant 329 : index
    %c0_46 = arith.constant 0 : index
    %151 = vector.load %arg2[%c329, %c0_46] : memref<336x128xf32, #tpu.memory_space<vmem>>, vector<1x32xf32>
    %c330 = arith.constant 330 : index
    %c0_47 = arith.constant 0 : index
    %152 = vector.load %arg2[%c330, %c0_47] : memref<336x128xf32, #tpu.memory_space<vmem>>, vector<1x32xf32>
    %c331 = arith.constant 331 : index
    %c0_48 = arith.constant 0 : index
    %153 = vector.load %arg2[%c331, %c0_48] : memref<336x128xf32, #tpu.memory_space<vmem>>, vector<1x32xf32>
    %c332 = arith.constant 332 : index
    %c0_49 = arith.constant 0 : index
    %154 = vector.load %arg2[%c332, %c0_49] : memref<336x128xf32, #tpu.memory_space<vmem>>, vector<1x64xf32>
    %c333 = arith.constant 333 : index
    %c0_50 = arith.constant 0 : index
    %155 = vector.load %arg2[%c333, %c0_50] : memref<336x128xf32, #tpu.memory_space<vmem>>, vector<1x32xf32>
    %c334 = arith.constant 334 : index
    %c0_51 = arith.constant 0 : index
    %156 = vector.load %arg2[%c334, %c0_51] : memref<336x128xf32, #tpu.memory_space<vmem>>, vector<1x32xf32>
    %c335 = arith.constant 335 : index
    %c0_52 = arith.constant 0 : index
    %157 = vector.load %arg2[%c335, %c0_52] : memref<336x128xf32, #tpu.memory_space<vmem>>, vector<1x32xf32>
    %cst_53 = arith.constant dense<0.000000e+00> : vector<16x96xf32>
    %158 = tpu.matmul %145, %146, %cst_53 {dimension_numbers = #tpu.dot_dimension_numbers<[1], [0], [0], [1], [0, 0, 1, 1], [], []>} : vector<16x32xf32>, vector<32x96xf32>, vector<16x96xf32> -> vector<16x96xf32>
    %159 = vector.broadcast %150 : vector<1x96xf32> to vector<16x96xf32>
    %160 = arith.addf %158, %159 : vector<16x96xf32>
    %161 = vector.extract_strided_slice %160 {offsets = [0, 0], sizes = [16, 8], strides = [1, 1]} : vector<16x96xf32> to vector<16x8xf32>
    %162 = vector.shape_cast %161 : vector<16x8xf32> to vector<2x8x8xf32>
    %163 = vector.extract_strided_slice %160 {offsets = [0, 8], sizes = [16, 8], strides = [1, 1]} : vector<16x96xf32> to vector<16x8xf32>
    %164 = vector.shape_cast %163 : vector<16x8xf32> to vector<2x8x8xf32>
    %165 = vector.extract_strided_slice %160 {offsets = [0, 16], sizes = [16, 8], strides = [1, 1]} : vector<16x96xf32> to vector<16x8xf32>
    %166 = vector.shape_cast %165 : vector<16x8xf32> to vector<2x8x8xf32>
    %167 = vector.extract_strided_slice %160 {offsets = [0, 24], sizes = [16, 8], strides = [1, 1]} : vector<16x96xf32> to vector<16x8xf32>
    %168 = vector.shape_cast %167 : vector<16x8xf32> to vector<2x8x8xf32>
    %169 = tpu.concatenate %162, %164, %166, %168 in 0 : vector<2x8x8xf32>, vector<2x8x8xf32>, vector<2x8x8xf32>, vector<2x8x8xf32> -> vector<8x8x8xf32>
    %170 = vector.extract_strided_slice %160 {offsets = [0, 32], sizes = [16, 8], strides = [1, 1]} : vector<16x96xf32> to vector<16x8xf32>
    %171 = vector.shape_cast %170 : vector<16x8xf32> to vector<2x8x8xf32>
    %172 = vector.extract_strided_slice %160 {offsets = [0, 40], sizes = [16, 8], strides = [1, 1]} : vector<16x96xf32> to vector<16x8xf32>
    %173 = vector.shape_cast %172 : vector<16x8xf32> to vector<2x8x8xf32>
    %174 = vector.extract_strided_slice %160 {offsets = [0, 48], sizes = [16, 8], strides = [1, 1]} : vector<16x96xf32> to vector<16x8xf32>
    %175 = vector.shape_cast %174 : vector<16x8xf32> to vector<2x8x8xf32>
    %176 = vector.extract_strided_slice %160 {offsets = [0, 56], sizes = [16, 8], strides = [1, 1]} : vector<16x96xf32> to vector<16x8xf32>
    %177 = vector.shape_cast %176 : vector<16x8xf32> to vector<2x8x8xf32>
    %178 = tpu.concatenate %171, %173, %175, %177 in 0 : vector<2x8x8xf32>, vector<2x8x8xf32>, vector<2x8x8xf32>, vector<2x8x8xf32> -> vector<8x8x8xf32>
    %179 = vector.extract_strided_slice %160 {offsets = [0, 64], sizes = [16, 8], strides = [1, 1]} : vector<16x96xf32> to vector<16x8xf32>
    %180 = vector.shape_cast %179 : vector<16x8xf32> to vector<2x8x8xf32>
    %181 = vector.extract_strided_slice %160 {offsets = [0, 72], sizes = [16, 8], strides = [1, 1]} : vector<16x96xf32> to vector<16x8xf32>
    %182 = vector.shape_cast %181 : vector<16x8xf32> to vector<2x8x8xf32>
    %183 = vector.extract_strided_slice %160 {offsets = [0, 80], sizes = [16, 8], strides = [1, 1]} : vector<16x96xf32> to vector<16x8xf32>
    %184 = vector.shape_cast %183 : vector<16x8xf32> to vector<2x8x8xf32>
    %185 = vector.extract_strided_slice %160 {offsets = [0, 88], sizes = [16, 8], strides = [1, 1]} : vector<16x96xf32> to vector<16x8xf32>
    %186 = vector.shape_cast %185 : vector<16x8xf32> to vector<2x8x8xf32>
    %187 = tpu.concatenate %180, %182, %184, %186 in 0 : vector<2x8x8xf32>, vector<2x8x8xf32>, vector<2x8x8xf32>, vector<2x8x8xf32> -> vector<8x8x8xf32>
    %cst_54 = arith.constant dense<0.000000e+00> : vector<8x8x8xf32>
    %188 = tpu.matmul %169, %178, %cst_54 {dimension_numbers = #tpu.dot_dimension_numbers<[2], [2], [1], [1], [0, 0, 0, 1, 1, 1], [0], [0]>} : vector<8x8x8xf32>, vector<8x8x8xf32>, vector<8x8x8xf32> -> vector<8x8x8xf32>
    %189 = vector.shape_cast %16 : vector<8x8xf32> to vector<1x8x8xf32>
    %190 = vector.broadcast %189 : vector<1x8x8xf32> to vector<8x8x8xf32>
    %191 = arith.addf %188, %190 : vector<8x8x8xf32>
    %cst_55 = arith.constant dense<0xFF800000> : vector<8x8xf32>
    %192 = vector.multi_reduction <maximumf>, %191, %cst_55 [2] : vector<8x8x8xf32> to vector<8x8xf32>
    %193 = vector.shape_cast %192 : vector<8x8xf32> to vector<8x8x1xf32>
    %194 = vector.broadcast %193 : vector<8x8x1xf32> to vector<8x8x8xf32>
    %195 = arith.subf %191, %194 : vector<8x8x8xf32>
    %196 = math.exp %195 : vector<8x8x8xf32>
    %cst_56 = arith.constant dense<0.000000e+00> : vector<8x8xf32>
    %197 = vector.multi_reduction <add>, %196, %cst_56 [2] : vector<8x8x8xf32> to vector<8x8xf32>
    %198 = vector.shape_cast %197 : vector<8x8xf32> to vector<8x8x1xf32>
    %199 = vector.broadcast %198 : vector<8x8x1xf32> to vector<8x8x8xf32>
    %200 = arith.divf %196, %199 : vector<8x8x8xf32>
    %cst_57 = arith.constant dense<0.000000e+00> : vector<8x8x8xf32>
    %201 = tpu.matmul %200, %187, %cst_57 {dimension_numbers = #tpu.dot_dimension_numbers<[2], [1], [1], [2], [0, 0, 0, 1, 1, 2], [0], [0]>} : vector<8x8x8xf32>, vector<8x8x8xf32>, vector<8x8x8xf32> -> vector<8x8x8xf32>
    %202 = vector.extract_strided_slice %201 {offsets = [0, 0, 0], sizes = [2, 8, 8], strides = [1, 1, 1]} : vector<8x8x8xf32> to vector<2x8x8xf32>
    %203 = vector.shape_cast %202 : vector<2x8x8xf32> to vector<16x8xf32>
    %204 = vector.extract_strided_slice %201 {offsets = [2, 0, 0], sizes = [2, 8, 8], strides = [1, 1, 1]} : vector<8x8x8xf32> to vector<2x8x8xf32>
    %205 = vector.shape_cast %204 : vector<2x8x8xf32> to vector<16x8xf32>
    %206 = vector.extract_strided_slice %201 {offsets = [4, 0, 0], sizes = [2, 8, 8], strides = [1, 1, 1]} : vector<8x8x8xf32> to vector<2x8x8xf32>
    %207 = vector.shape_cast %206 : vector<2x8x8xf32> to vector<16x8xf32>
    %208 = vector.extract_strided_slice %201 {offsets = [6, 0, 0], sizes = [2, 8, 8], strides = [1, 1, 1]} : vector<8x8x8xf32> to vector<2x8x8xf32>
    %209 = vector.shape_cast %208 : vector<2x8x8xf32> to vector<16x8xf32>
    %210 = tpu.concatenate %203, %205, %207, %209 in 1 : vector<16x8xf32>, vector<16x8xf32>, vector<16x8xf32>, vector<16x8xf32> -> vector<16x32xf32>
    %cst_58 = arith.constant dense<0.000000e+00> : vector<16x32xf32>
    %211 = tpu.matmul %210, %147, %cst_58 {dimension_numbers = #tpu.dot_dimension_numbers<[1], [0], [0], [1], [0, 0, 1, 1], [], []>} : vector<16x32xf32>, vector<32x32xf32>, vector<16x32xf32> -> vector<16x32xf32>
    %212 = vector.broadcast %151 : vector<1x32xf32> to vector<16x32xf32>
    %213 = arith.addf %211, %212 : vector<16x32xf32>
    %cst_59 = arith.constant dense<0.000000e+00> : vector<16xf32>
    %214 = vector.multi_reduction <add>, %213, %cst_59 [1] : vector<16x32xf32> to vector<16xf32>
    %215 = vector.shape_cast %214 : vector<16xf32> to vector<16x1xf32>
    %cst_60 = arith.constant 3.200000e+01 : f32
    %216 = vector.broadcast %cst_60 : f32 to vector<16x1xf32>
    %217 = arith.divf %215, %216 : vector<16x1xf32>
    %218 = vector.broadcast %217 : vector<16x1xf32> to vector<16x32xf32>
    %219 = arith.subf %213, %218 : vector<16x32xf32>
    %220 = arith.mulf %219, %219 : vector<16x32xf32>
    %cst_61 = arith.constant dense<0.000000e+00> : vector<16xf32>
    %221 = vector.multi_reduction <add>, %220, %cst_61 [1] : vector<16x32xf32> to vector<16xf32>
    %222 = vector.shape_cast %221 : vector<16xf32> to vector<16x1xf32>
    %cst_62 = arith.constant 3.200000e+01 : f32
    %223 = vector.broadcast %cst_62 : f32 to vector<16x1xf32>
    %224 = arith.divf %222, %223 : vector<16x1xf32>
    %cst_63 = arith.constant 9.99999974E-6 : f32
    %225 = vector.broadcast %cst_63 : f32 to vector<16x1xf32>
    %226 = arith.addf %224, %225 : vector<16x1xf32>
    %227 = math.rsqrt %226 : vector<16x1xf32>
    %228 = vector.broadcast %227 : vector<16x1xf32> to vector<16x32xf32>
    %229 = arith.mulf %219, %228 : vector<16x32xf32>
    %230 = vector.broadcast %152 : vector<1x32xf32> to vector<16x32xf32>
    %231 = arith.mulf %229, %230 : vector<16x32xf32>
    %232 = vector.broadcast %153 : vector<1x32xf32> to vector<16x32xf32>
    %233 = arith.addf %231, %232 : vector<16x32xf32>
    %234 = arith.addf %145, %233 : vector<16x32xf32>
    %cst_64 = arith.constant dense<0.000000e+00> : vector<16x64xf32>
    %235 = tpu.matmul %234, %148, %cst_64 {dimension_numbers = #tpu.dot_dimension_numbers<[1], [0], [0], [1], [0, 0, 1, 1], [], []>} : vector<16x32xf32>, vector<32x64xf32>, vector<16x64xf32> -> vector<16x64xf32>
    %236 = vector.broadcast %154 : vector<1x64xf32> to vector<16x64xf32>
    %237 = arith.addf %235, %236 : vector<16x64xf32>
    %cst_65 = arith.constant 5.000000e-01 : f32
    %238 = vector.broadcast %cst_65 : f32 to vector<16x64xf32>
    %239 = arith.mulf %238, %237 : vector<16x64xf32>
    %cst_66 = arith.constant 4.471500e-02 : f32
    %240 = vector.broadcast %cst_66 : f32 to vector<16x64xf32>
    %241 = arith.mulf %240, %237 : vector<16x64xf32>
    %242 = arith.mulf %241, %237 : vector<16x64xf32>
    %243 = arith.mulf %242, %237 : vector<16x64xf32>
    %244 = arith.addf %237, %243 : vector<16x64xf32>
    %cst_67 = arith.constant 0.797884583 : f32
    %245 = vector.broadcast %cst_67 : f32 to vector<16x64xf32>
    %246 = arith.mulf %245, %244 : vector<16x64xf32>
    %247 = math.tanh %246 : vector<16x64xf32>
    %cst_68 = arith.constant 1.000000e+00 : f32
    %248 = vector.broadcast %cst_68 : f32 to vector<16x64xf32>
    %249 = arith.addf %248, %247 : vector<16x64xf32>
    %250 = arith.mulf %239, %249 : vector<16x64xf32>
    %cst_69 = arith.constant dense<0.000000e+00> : vector<16x32xf32>
    %251 = tpu.matmul %250, %149, %cst_69 {dimension_numbers = #tpu.dot_dimension_numbers<[1], [0], [0], [1], [0, 0, 1, 1], [], []>} : vector<16x64xf32>, vector<64x32xf32>, vector<16x32xf32> -> vector<16x32xf32>
    %252 = vector.broadcast %155 : vector<1x32xf32> to vector<16x32xf32>
    %253 = arith.addf %251, %252 : vector<16x32xf32>
    %cst_70 = arith.constant dense<0.000000e+00> : vector<16xf32>
    %254 = vector.multi_reduction <add>, %253, %cst_70 [1] : vector<16x32xf32> to vector<16xf32>
    %255 = vector.shape_cast %254 : vector<16xf32> to vector<16x1xf32>
    %cst_71 = arith.constant 3.200000e+01 : f32
    %256 = vector.broadcast %cst_71 : f32 to vector<16x1xf32>
    %257 = arith.divf %255, %256 : vector<16x1xf32>
    %258 = vector.broadcast %257 : vector<16x1xf32> to vector<16x32xf32>
    %259 = arith.subf %253, %258 : vector<16x32xf32>
    %260 = arith.mulf %259, %259 : vector<16x32xf32>
    %cst_72 = arith.constant dense<0.000000e+00> : vector<16xf32>
    %261 = vector.multi_reduction <add>, %260, %cst_72 [1] : vector<16x32xf32> to vector<16xf32>
    %262 = vector.shape_cast %261 : vector<16xf32> to vector<16x1xf32>
    %cst_73 = arith.constant 3.200000e+01 : f32
    %263 = vector.broadcast %cst_73 : f32 to vector<16x1xf32>
    %264 = arith.divf %262, %263 : vector<16x1xf32>
    %cst_74 = arith.constant 9.99999974E-6 : f32
    %265 = vector.broadcast %cst_74 : f32 to vector<16x1xf32>
    %266 = arith.addf %264, %265 : vector<16x1xf32>
    %267 = math.rsqrt %266 : vector<16x1xf32>
    %268 = vector.broadcast %267 : vector<16x1xf32> to vector<16x32xf32>
    %269 = arith.mulf %259, %268 : vector<16x32xf32>
    %270 = vector.broadcast %156 : vector<1x32xf32> to vector<16x32xf32>
    %271 = arith.mulf %269, %270 : vector<16x32xf32>
    %272 = vector.broadcast %157 : vector<1x32xf32> to vector<16x32xf32>
    %273 = arith.addf %271, %272 : vector<16x32xf32>
    %274 = arith.addf %234, %273 : vector<16x32xf32>
    %cst_75 = arith.constant dense<0.000000e+00> : vector<16xf32>
    %275 = vector.multi_reduction <add>, %274, %cst_75 [1] : vector<16x32xf32> to vector<16xf32>
    %276 = vector.shape_cast %275 : vector<16xf32> to vector<16x1xf32>
    %cst_76 = arith.constant 3.200000e+01 : f32
    %277 = vector.broadcast %cst_76 : f32 to vector<16x1xf32>
    %278 = arith.divf %276, %277 : vector<16x1xf32>
    %279 = vector.broadcast %278 : vector<16x1xf32> to vector<16x32xf32>
    %280 = arith.subf %274, %279 : vector<16x32xf32>
    %281 = arith.mulf %280, %280 : vector<16x32xf32>
    %cst_77 = arith.constant dense<0.000000e+00> : vector<16xf32>
    %282 = vector.multi_reduction <add>, %281, %cst_77 [1] : vector<16x32xf32> to vector<16xf32>
    %283 = vector.shape_cast %282 : vector<16xf32> to vector<16x1xf32>
    %cst_78 = arith.constant 3.200000e+01 : f32
    %284 = vector.broadcast %cst_78 : f32 to vector<16x1xf32>
    %285 = arith.divf %283, %284 : vector<16x1xf32>
    %cst_79 = arith.constant 9.99999974E-6 : f32
    %286 = vector.broadcast %cst_79 : f32 to vector<16x1xf32>
    %287 = arith.addf %285, %286 : vector<16x1xf32>
    %288 = math.rsqrt %287 : vector<16x1xf32>
    %289 = vector.broadcast %288 : vector<16x1xf32> to vector<16x32xf32>
    %290 = arith.mulf %280, %289 : vector<16x32xf32>
    %c0_80 = arith.constant 0 : index
    %c0_81 = arith.constant 0 : index
    %291 = vector.load %arg3[%c0_80, %c0_81] : memref<33x512xf32, #tpu.memory_space<vmem>>, vector<32x512xf32>
    %cst_82 = arith.constant dense<0.000000e+00> : vector<16x512xf32>
    %292 = tpu.matmul %290, %291, %cst_82 {dimension_numbers = #tpu.dot_dimension_numbers<[1], [0], [0], [1], [0, 0, 1, 1], [], []>} : vector<16x32xf32>, vector<32x512xf32>, vector<16x512xf32> -> vector<16x512xf32>
    %c32_83 = arith.constant 32 : index
    %c0_84 = arith.constant 0 : index
    %293 = vector.load %arg3[%c32_83, %c0_84] : memref<33x512xf32, #tpu.memory_space<vmem>>, vector<1x512xf32>
    %294 = vector.broadcast %293 : vector<1x512xf32> to vector<16x512xf32>
    %295 = arith.addf %292, %294 : vector<16x512xf32>
    %296 = vector.shape_cast %295 : vector<16x512xf32> to vector<2x8x512xf32>
    %c0_85 = arith.constant 0 : index
    %c0_86 = arith.constant 0 : index
    %c0_87 = arith.constant 0 : index
    %297 = vector.load %arg4[%c0_85, %c0_86, %c0_87] : memref<2x8x512xf32, #tpu.memory_space<vmem>>, vector<2x8x512xf32>
    tpu.vector_store %arg4[%c0_85, %c0_86, %c0_87], %296 {strides = array<i32>} : memref<2x8x512xf32, #tpu.memory_space<vmem>>, vector<2x8x512xf32>,
    return
  }
}

</mosaic_0001>

<bundles_post_ra>
// kernel: hpgpt_forward.1
= control target key start
LH: loop header
LB: loop body
LE: loop exit
PB: predicated region body
PF: predicated region fallthrough
CT: control target
= control target key end

     0   :  { %v5011_v2 = vmov 0   ;;  %s5959_s0 = inlined_call_operand.vmem [shape: s32[16,1], index: 0, kind: input, shape index: {}]   ;;  %s5960_s1 = inlined_call_operand.vmem [shape: f32[520,32], index: 1, kind: input, shape index: {}]   ;;  %s5961_s2 = inlined_call_operand.vmem [shape: f32[336,128], index: 2, kind: input, shape index: {}]   ;;  %s5962_s3 = inlined_call_operand.vmem [shape: f32[33,512], index: 3, kind: input, shape index: {}]   ;;  %s5963_s4 = inlined_call_operand.hbm [shape: f32[2,8,512], index: 4, kind: output, shape index: {}]  }
   0x1   :  { %v18_v0 = vld [vmem:[%s5959_s0] sm:$0xff]  ;;  %4894 = vset.pattern.permute.xlu0 %v5011_v2  ;;  %v19_v3 = vld [vmem:[%s5959_s0 + $0x8] sm:$0xff]  ;;  %v73_v14 = vld [vmem:[%s5960_s1 + $0x90] sm:$0xff] }
   0x2   :  { %v71_v1 = vld [vmem:[%s5960_s1 + $0x80] sm:$0xff]  ;;  %v72_v4 = vld [vmem:[%s5960_s1 + $0x88] sm:$0xff]  ;;  %26 = vperm.xlu0 %4894, %v18_v0   ;;  %v74_v15 = vld [vmem:[%s5960_s1 + $0x98] sm:$0xff] }
   0x3   :  { %v103_v5 = vld [vmem:[%s5960_s1 + $0x180] sm:$0xff]  ;;  %v104_v6 = vld [vmem:[%s5960_s1 + $0x188] sm:$0xff]  ;;  %v4718_v7 = vpack.c.bf16 %v72_v4, %v71_v1  ;;  %v4722_v17 = vpack.c.bf16 %v74_v15, %v73_v14  ;;  %v105_v18 = vld [vmem:[%s5960_s1 + $0x190] sm:$0xff] }
   0x4   :  { %v4750_v8 = vpack.c.bf16 %v104_v6, %v103_v5  ;;  %v55_v9 = vld [vmem:[%s5960_s1] sm:$0xff]  ;;  %v56_v10 = vld [vmem:[%s5960_s1 + $0x8] sm:$0xff]  ;;  %v106_v19 = vld [vmem:[%s5960_s1 + $0x198] sm:$0xff] }
   0x5   :  { %v87_v11 = vld [vmem:[%s5960_s1 + $0x100] sm:$0xff]  ;;  %v4720_v12 = vpack.c.bf16 %v56_v10, %v55_v9  ;;  %v88_v13 = vld [vmem:[%s5960_s1 + $0x108] sm:$0xff]  ;;  %4719 = vmatprep.subr.bf16.mxu0 %v4718_v7  ;;  %v57_v20 = vld [vmem:[%s5960_s1 + $0x10] sm:$0xff]  ;;  %v4754_v21 = vpack.c.bf16 %v106_v19, %v105_v18 }
   0x6   :  { %4751 = vmatprep.subr.bf16.mxu1 %v4750_v8  ;;  %v4752_v16 = vpack.c.bf16 %v88_v13, %v87_v11  ;;  %v58_v22 = vld [vmem:[%s5960_s1 + $0x18] sm:$0xff]  ;;  %v89_v23 = vld [vmem:[%s5960_s1 + $0x110] sm:$0xff]  ;;  %29 = vperm.xlu0 %4894, %v19_v3   ;;  %v75_v27 = vld [vmem:[%s5960_s1 + $0xa0] sm:$0xff] }
   0x7   :  { %4721 = vmatpush3.bf16.msra.mxu0 %v4720_v12  ;;  %v90_v24 = vld [vmem:[%s5960_s1 + $0x118] sm:$0xff]  ;;  %v4724_v25 = vpack.c.bf16 %v58_v22, %v57_v20  ;;  %v76_v28 = vld [vmem:[%s5960_s1 + $0xa8] sm:$0xff]  ;;  %v107_v29 = vld [vmem:[%s5960_s1 + $0x1a0] sm:$0xff] }
   0x8   :  { %4753 = vmatpush3.bf16.msra.mxu1 %v4752_v16  ;;  %v4756_v26 = vpack.c.bf16 %v90_v24, %v89_v23  ;;  %4723 = vmatprep.subr.bf16.mxu0 %v4722_v17  ;;  %v4726_v30 = vpack.c.bf16 %v76_v28, %v75_v27  ;;  %v108_v31 = vld [vmem:[%s5960_s1 + $0x1a8] sm:$0xff]  ;;  %v59_v32 = vld [vmem:[%s5960_s1 + $0x20] sm:$0xff]  ;;  %v77_v37 = vld [vmem:[%s5960_s1 + $0xb0] sm:$0xff] }
   0x9   :  { %4755 = vmatprep.subr.bf16.mxu1 %v4754_v21  ;;  %v60_v33 = vld [vmem:[%s5960_s1 + $0x28] sm:$0xff]  ;;  %v4758_v34 = vpack.c.bf16 %v108_v31, %v107_v29  ;;  %v91_v35 = vld [vmem:[%s5960_s1 + $0x120] sm:$0xff]  ;;  %v78_v39 = vld [vmem:[%s5960_s1 + $0xb8] sm:$0xff] }
   0xa   :  { %v92_v36 = vld [vmem:[%s5960_s1 + $0x128] sm:$0xff]  ;;  %v4728_v38 = vpack.c.bf16 %v60_v33, %v59_v32  ;;  %v109_v40 = vld [vmem:[%s5960_s1 + $0x1b0] sm:$0xff]  ;;  %v110_v41 = vld [vmem:[%s5960_s1 + $0x1b8] sm:$0xff]  ;;  %v4730_v43 = vpack.c.bf16 %v78_v39, %v77_v37 }
   0xb   :  { %4725 = vmatpush3.bf16.msra.mxu0 %v4724_v25  ;;  %v4760_v42 = vpack.c.bf16 %v92_v36, %v91_v35  ;;  %v61_v44 = vld [vmem:[%s5960_s1 + $0x30] sm:$0xff]  ;;  %v62_v45 = vld [vmem:[%s5960_s1 + $0x38] sm:$0xff]  ;;  %v4762_v47 = vpack.c.bf16 %v110_v41, %v109_v40  ;;  %v79_v49 = vld [vmem:[%s5960_s1 + $0xc0] sm:$0xff] }
   0xc   :  { %4757 = vmatpush3.bf16.msra.mxu1 %v4756_v26  ;;  %4727 = vmatprep.subr.bf16.mxu0 %v4726_v30  ;;  %v93_v46 = vld [vmem:[%s5960_s1 + $0x130] sm:$0xff]  ;;  %v94_v48 = vld [vmem:[%s5960_s1 + $0x138] sm:$0xff]  ;;  %v80_v50 = vld [vmem:[%s5960_s1 + $0xc8] sm:$0xff]  ;;  %v4732_v53 = vpack.c.bf16 %v62_v45, %v61_v44 }
   0xd   :  { %4759 = vmatprep.subr.bf16.mxu1 %v4758_v34  ;;  %v111_v51 = vld [vmem:[%s5960_s1 + $0x1c0] sm:$0xff]  ;;  %v112_v52 = vld [vmem:[%s5960_s1 + $0x1c8] sm:$0xff]  ;;  %v4764_v54 = vpack.c.bf16 %v94_v48, %v93_v46  ;;  %v4734_v55 = vpack.c.bf16 %v80_v50, %v79_v49  ;;  %v81_v61 = vld [vmem:[%s5960_s1 + $0xd0] sm:$0xff] }
   0xe   :  { %v63_v56 = vld [vmem:[%s5960_s1 + $0x40] sm:$0xff]  ;;  %v64_v57 = vld [vmem:[%s5960_s1 + $0x48] sm:$0xff]  ;;  %v4766_v59 = vpack.c.bf16 %v112_v52, %v111_v51  ;;  %v82_v62 = vld [vmem:[%s5960_s1 + $0xd8] sm:$0xff] }
   0xf   :  { %4729 = vmatpush3.bf16.msra.mxu0 %v4728_v38  ;;  %v95_v58 = vld [vmem:[%s5960_s1 + $0x140] sm:$0xff]  ;;  %v96_v60 = vld [vmem:[%s5960_s1 + $0x148] sm:$0xff]  ;;  %v113_v63 = vld [vmem:[%s5960_s1 + $0x1d0] sm:$0xff]  ;;  %v4736_v1 = vpack.c.bf16 %v64_v57, %v63_v56  ;;  %v4738_v3 = vpack.c.bf16 %v82_v62, %v81_v61 }
  0x10   :  { %4761 = vmatpush3.bf16.msra.mxu1 %v4760_v42  ;;  %4731 = vmatprep.subr.bf16.mxu0 %v4730_v43  ;;  %v114_v0 = vld [vmem:[%s5960_s1 + $0x1d8] sm:$0xff]  ;;  %v4768_v2 = vpack.c.bf16 %v96_v60, %v95_v58  ;;  %v65_v4 = vld [vmem:[%s5960_s1 + $0x50] sm:$0xff]  ;;  %v83_v9 = vld [vmem:[%s5960_s1 + $0xe0] sm:$0xff] }
  0x11   :  { %4763 = vmatprep.subr.bf16.mxu1 %v4762_v47  ;;  %v66_v5 = vld [vmem:[%s5960_s1 + $0x58] sm:$0xff]  ;;  %v97_v6 = vld [vmem:[%s5960_s1 + $0x150] sm:$0xff]  ;;  %v4770_v7 = vpack.c.bf16 %v114_v0, %v113_v63  ;;  %v84_v10 = vld [vmem:[%s5960_s1 + $0xe8] sm:$0xff] }
  0x12   :  { %v98_v8 = vld [vmem:[%s5960_s1 + $0x158] sm:$0xff]  ;;  %v115_v11 = vld [vmem:[%s5960_s1 + $0x1e0] sm:$0xff]  ;;  %v116_v12 = vld [vmem:[%s5960_s1 + $0x1e8] sm:$0xff]  ;;  %v4740_v13 = vpack.c.bf16 %v66_v5, %v65_v4  ;;  %v4742_v16 = vpack.c.bf16 %v84_v10, %v83_v9 }
  0x13   :  { %4733 = vmatpush3.bf16.msra.mxu0 %v4732_v53  ;;  %v67_v14 = vld [vmem:[%s5960_s1 + $0x60] sm:$0xff]  ;;  %v4772_v15 = vpack.c.bf16 %v98_v8, %v97_v6  ;;  %v68_v17 = vld [vmem:[%s5960_s1 + $0x68] sm:$0xff] }
  0x14   :  { %4765 = vmatpush3.bf16.msra.mxu1 %v4764_v54  ;;  %4735 = vmatprep.subr.bf16.mxu0 %v4734_v55  ;;  %v99_v18 = vld [vmem:[%s5960_s1 + $0x160] sm:$0xff] }
  0x15   :  { %4767 = vmatprep.subr.bf16.mxu1 %v4766_v59 }
  0x17   :  { %4737 = vmatpush3.bf16.msra.mxu0 %v4736_v1 }
  0x18   :  { %4769 = vmatpush3.bf16.msra.mxu1 %v4768_v2  ;;  %4739 = vmatprep.subr.bf16.mxu0 %v4738_v3 }
  0x19   :  { %9 = vsyncpa [#allocation3], 0  ;;  %4771 = vmatprep.subr.bf16.mxu1 %v4770_v7  ;;  %v4774_v19 = vpack.c.bf16 %v116_v12, %v115_v11  ;;  %v100_v20 = vld [vmem:[%s5960_s1 + $0x168] sm:$0xff]  ;;  %v85_v21 = vld [vmem:[%s5960_s1 + $0xf0] sm:$0xff]  ;;  %v4744_v25 = vpack.c.bf16 %v68_v17, %v67_v14  ;;  %v20_v35 = vlaneseq  ;;  %v5012_v41 = vmov 1.0   ;;  %s5015_s23 = smov 112  }
  0x1a   :  { %v86_v22 = vld [vmem:[%s5960_s1 + $0xf8] sm:$0xff]  ;;  %v117_v23 = vld [vmem:[%s5960_s1 + $0x1f0] sm:$0xff]  ;;  %v4776_v26 = vpack.c.bf16 %v100_v20, %v99_v18  ;;  %v274_v43 = vld [vmem:[%s5961_s2] sm:$0xff]  ;;  %vm306_vm8 = vcmask 261120   ;;  %v5013_v2 = vmov 0.0   ;;  %vm5014_vm9 = vmmov 0  }
  0x1b   :  { %v118_v24 = vld [vmem:[%s5960_s1 + $0x1f8] sm:$0xff]  ;;  %4741 = vmatpush3.bf16.msra.mxu0 %v4740_v13  ;;  %v4746_v27 = vpack.c.bf16 %v86_v22, %v85_v21  ;;  %v69_v28 = vld [vmem:[%s5960_s1 + $0x70] sm:$0xff]  ;;  %v5251_v36 = vand.u32 127, %v20_v35  ;;  %v275_v44 = vld [vmem:[%s5961_s2 + $0x8] sm:$0xff]  ;;  %s5016_s24 = smov 120   ;;  %s5017_s25 = smov 104  }
  0x1c   :  { %4773 = vmatpush3.bf16.msra.mxu1 %v4772_v15  ;;  %4743 = vmatprep.subr.bf16.mxu0 %v4742_v16  ;;  %v70_v29 = vld [vmem:[%s5960_s1 + $0x78] sm:$0xff]  ;;  %v4778_v30 = vpack.c.bf16 %v118_v24, %v117_v23  ;;  %v101_v31 = vld [vmem:[%s5960_s1 + $0x170] sm:$0xff]  ;;  %v4782_v45 = vpack.c.bf16 %v275_v44, %v274_v43  ;;  %v119_v51 = vld [vmem:[%s5960_s1 + $0x200] sm:$0xff]  ;;  %s5018_s26 = smov 96   ;;  %vm404_vm10 = vcmask 64512   ;;  %v5383_v22 = vshrl.u32 %v20_v35, 7 }
  0x1d   :  { %4775 = vmatprep.subr.bf16.mxu1 %v4774_v19  ;;  %v102_v32 = vld [vmem:[%s5960_s1 + $0x178] sm:$0xff]  ;;  %v4748_v33 = vpack.c.bf16 %v70_v29, %v69_v28  ;;  %v22_v37 = vadd.s32 128, %v5251_v36  ;;  %v24_v38 = vadd.s32 384, %v5251_v36  ;;  %v23_v39 = vadd.s32 256, %v5251_v36  ;;  %v276_v46 = vld [vmem:[%s5961_s2 + $0x10] sm:$0xff]  ;;  %s5020_s27 = smov 64  }
  0x1e   :  { %v4780_v34 = vpack.c.bf16 %v102_v32, %v101_v31  ;;  %v277_v47 = vld [vmem:[%s5961_s2 + $0x18] sm:$0xff]  ;;  %v4173_v3 = vld [vmem:[%s5961_s2 + $0xa0] ss:$0 sm:$0xff]  ;;  %vm272_vm11 = vcmp.le.s32.totalorder %v5251_v36, %v5383_v22  ;;  %v5019_v23 = vmov -1e+30   ;;  %s5021_s9 = smov 8  }
  0x1f   :  { %4745 = vmatpush3.bf16.msra.mxu0 %v4744_v25  ;;  %v4786_v48 = vpack.c.bf16 %v277_v47, %v276_v46  ;;  %v5387_v24 = vsel %vm272_vm11, 0.0, %v5019_v23  ;;  %s5022_s10 = smov 16   ;;  %s5023_s11 = smov 24   ;;  %vm1733_vm12 = vcmask 130048   ;;  %vm1736_vm13 = vcmask 195584  }
  0x20   :  { %4777 = vmatpush3.bf16.msra.mxu1 %v4776_v26  ;;  %4747 = vmatprep.subr.bf16.mxu0 %v4746_v27  ;;  %vm1972_vm14 = vcmask 523264  }
  0x21   :  { %4779 = vmatprep.subr.bf16.mxu1 %v4778_v30 }
  0x23   :  { %4749 = vmatpush3.bf16.msra.mxu0 %v4748_v33 }
  0x24   :  { %4781 = vmatpush3.bf16.msra.mxu1 %v4780_v34  ;;  %4470 = vmatprep.subr.mxu0 %v5013_v2 }
  0x25   :  { %4783 = vmatprep.subr.bf16.mxu1 %v4782_v45 }
  0x81   :  { %v27_v40 = vpop.permute.xlu0 %26 }
  0x82   :  { %vm32_vm0 = vcmp.eq.s32.totalorder %v22_v37, %v27_v40  ;;  %vm34_vm1 = vcmp.eq.s32.totalorder %v24_v38, %v27_v40  ;;  %vm31_vm2 = vcmp.eq.s32.totalorder %v5251_v36, %v27_v40  ;;  %vm33_vm3 = vcmp.eq.s32.totalorder %v23_v39, %v27_v40 }
  0x83   :  { %4165 = vmatprep.mubr.msk.f32.mxu0 %vm32_vm0, %v5012_v41  ;;  %4169 = vmatprep.mubr.msk.f32.mxu1 %vm34_vm1, %v5012_v41 }
  0x84   :  { %4166 = vmatmul.mubr.msk.f32.vlgmr.msra.gmra.mrb[0].mxu0 %vm31_vm2, %v5012_v41  ;;  %4170 = vmatmul.mubr.msk.f32.vlgmr.msra.gmra.mrb[0].mxu1 %vm33_vm3, %v5012_v41 }
  0x85   :  { %v30_v42 = vpop.permute.xlu0 %29  ;;  %4785 = vmatpush3.bf16.msra.mxu1 %v4782_v45 }
  0x86   :  { %vm36_vm4 = vcmp.eq.s32.totalorder %v22_v37, %v30_v42  ;;  %vm38_vm5 = vcmp.eq.s32.totalorder %v24_v38, %v30_v42  ;;  %vm35_vm6 = vcmp.eq.s32.totalorder %v5251_v36, %v30_v42  ;;  %vm37_vm7 = vcmp.eq.s32.totalorder %v23_v39, %v30_v42  ;;  %4787 = vmatprep.subr.bf16.mxu1 %v4786_v48 }
  0x87   :  { %4167 = vmatprep.mubr.msk.f32.mxu0 %vm36_vm4, %v5012_v41  ;;  %4171 = vmatprep.mubr.msk.f32.mxu1 %vm38_vm5, %v5012_v41 }
  0x88   :  { %4168 = vmatmul.mubr.msk.f32.gmra.mrb[2].mxu0 %vm35_vm6, %v5012_v41  ;;  %4172 = vmatmul.mubr.msk.f32.gmra.mrb[2].mxu1 %vm37_vm7, %v5012_v41 }
  0x89   :  { %4789 = vmatpush3.bf16.msra.mxu1 %v4786_v48  ;;  %4472 = vmatprep.mubr.msk.f32.mxu0 %vm5014_vm9, %v5013_v2 }
  0x8a   :  { %4465 = vmatprep.subr.mxu1 %v5013_v2 }
 0x157   :  { %v4290_v49 = vpop.f32.mrb[0].mxu0  ;;  %v4328_v50 = vpop.f32.mrb[0].mxu1 }
 0x158   :  { %v4291_v52 = vpop.f32.mrb[1].mxu0  ;;  %v4329_v53 = vpop.f32.mrb[1].mxu1 }
 0x159   :  { %v4292_v54 = vadd.f32 %v4291_v52, %v4290_v49  ;;  %v4330_v55 = vadd.f32 %v4329_v53, %v4328_v50 }
 0x15b   :  { %v187_v56 = vadd.f32 %v4292_v54, %v119_v51  ;;  %v4293_v57 = vpop.f32.mrb[2].mxu0  ;;  %v4331_v58 = vpop.f32.mrb[2].mxu1 }
 0x15c   :  { %v4294_v59 = vpop.f32.mrb[3].mxu0  ;;  %v4332_v60 = vpop.f32.mrb[3].mxu1 }
 0x15d   :  { %v5273_v61 = vadd.f32 %v4330_v55, %v187_v56  ;;  %v4295_v62 = vadd.f32 %v4294_v59, %v4293_v57  ;;  %v4333_v63 = vadd.f32 %v4332_v60, %v4331_v58 }
 0x15f   :  { %v192_v0 = vadd.f32 %v4295_v62, %v119_v51  ;;  %4462 = vmatprep.mubr.msk.f32.mxu1 %vm306_vm8, %v5273_v61 }
 0x161   :  { %v5277_v1 = vadd.f32 %v4333_v63, %v192_v0 }
 0x163   :  { %4463 = vmatmul.mubr.msk.f32.vlgmr.msra.gmra.mrb[4].mxu1 %vm306_vm8, %v5277_v1 }
 0x164   :  { %4467 = vmatprep.mubr.msk.f32.mxu1 %vm5014_vm9, %v5013_v2 }
 0x236   :  { %v4464_v4 = vpop.f32.mrb[4].mxu1 }
 0x237   :  { %v379_v5 = vpop.f32.mrb[5].mxu1  ;;  %v5296_v7 = vadd.f32 %v4464_v4, %v4173_v3 }
 0x238   :  { %v5290_v6 = vadd.f32 %v4173_v3, %v379_v5 }
 0x23a   :  { %394 = vrot.lane.b32.xlu0 %v5290_v6, %s5015_s23  ;;  %390 = vrot.lane.b32.xlu1 %v5290_v6, %s5016_s24 }
 0x23e   :  { %398 = vrot.lane.b32.xlu0 %v5290_v6, %s5017_s25  ;;  %392 = vrot.lane.b32.xlu1 %v5296_v7, %s5016_s24 }
 0x242   :  { %402 = vrot.lane.b32.xlu0 %v5290_v6, %s5018_s26  ;;  %396 = vrot.lane.b32.xlu1 %v5296_v7, %s5015_s23 }
 0x246   :  { %400 = vrot.lane.b32.xlu1 %v5296_v7, %s5017_s25 }
 0x24a   :  { %479 = vrot.lane.b32.xlu1 %v5296_v7, %s5018_s26 }
 0x2ac   :  { %v5310_v8 = vpop.permute.xlu0 %394  ;;  %v5312_v9 = vpop.permute.xlu1 %390 }
 0x2ad   :  { %555 = vrot.lane.b32.xlu0 %v5312_v9, %s5018_s26 }
 0x2b0   :  { %v5316_v10 = vpop.permute.xlu0 %398  ;;  %v5318_v11 = vpop.permute.xlu1 %392 }
 0x2b1   :  { %707 = vrot.lane.b32.xlu0 %v5310_v8, %s5018_s26  ;;  %631 = vrot.lane.b32.xlu1 %v5318_v11, %s5018_s26 }
 0x2b4   :  { %v403_v12 = vpop.permute.xlu0 %402  ;;  %v5324_v13 = vpop.permute.xlu1 %396 }
 0x2b5   :  { %4466 = vmatpush3.xpose.msk.msra.mxu1 %vm404_vm10, %v403_v12  ;;  %859 = vrot.lane.b32.xlu0 %v5316_v10, %s5018_s26 }
 0x2b6   :  { %783 = vrot.lane.b32.xlu1 %v5324_v13, %s5018_s26  ;;  %4475 = vmatprep.subr.mxu1 %v5013_v2 }
 0x2b8   :  { %4468 = vmatmul.mubr.msk.f32.vlgmr.msra.gmra.mrb[6].mxu1 %vm404_vm10, %v5290_v6  ;;  %v5334_v14 = vpop.permute.xlu1 %400 }
 0x2b9   :  { %4477 = vmatprep.mubr.msk.f32.mxu1 %vm5014_vm9, %v5013_v2 }
 0x2ba   :  { %935 = vrot.lane.b32.xlu1 %v5334_v14, %s5018_s26 }
 0x2bc   :  { %v480_v15 = vpop.permute.xlu1 %479 }
 0x2bd   :  { %4471 = vmatpush3.xpose.msk.msra.mxu0 %vm404_vm10, %v480_v15 }
 0x2be   :  { %4480 = vmatprep.subr.mxu0 %v5013_v2 }
 0x2c0   :  { %4473 = vmatmul.mubr.msk.f32.vlgmr.msra.gmra.mrb[4].mxu0 %vm404_vm10, %v5296_v7 }
 0x2c1   :  { %4482 = vmatprep.mubr.msk.f32.mxu0 %vm5014_vm9, %v5013_v2 }
 0x31f   :  { %v556_v16 = vpop.permute.xlu0 %555 }
 0x320   :  { %4476 = vmatpush3.xpose.msk.msra.mxu1 %vm404_vm10, %v556_v16 }
 0x321   :  { %4485 = vmatprep.subr.mxu1 %v5013_v2 }
 0x323   :  { %4478 = vmatmul.mubr.msk.f32.vlgmr.msra.gmra.mrb[8].mxu1 %vm404_vm10, %v5312_v9  ;;  %v708_v17 = vpop.permute.xlu0 %707  ;;  %v632_v18 = vpop.permute.xlu1 %631 }
 0x324   :  { %4481 = vmatpush3.xpose.msk.msra.mxu0 %vm404_vm10, %v632_v18  ;;  %4486 = vmatpush3.xpose.msk.msra.mxu1 %vm404_vm10, %v708_v17 }
 0x325   :  { %4487 = vmatprep.mubr.msk.f32.mxu1 %vm5014_vm9, %v5013_v2  ;;  %4495 = vmatprep.subr.mxu1 %v5013_v2 }
 0x326   :  { %4490 = vmatprep.subr.mxu0 %v5013_v2 }
 0x327   :  { %4488 = vmatmul.mubr.msk.f32.vlgmr.msra.gmra.mrb[10].mxu1 %vm404_vm10, %v5310_v8  ;;  %v860_v19 = vpop.permute.xlu0 %859  ;;  %4483 = vmatmul.mubr.msk.f32.vlgmr.msra.gmra.mrb[6].mxu0 %vm404_vm10, %v5318_v11 }
 0x328   :  { %v784_v20 = vpop.permute.xlu1 %783  ;;  %4496 = vmatpush3.xpose.msk.msra.mxu1 %vm404_vm10, %v860_v19  ;;  %4492 = vmatprep.mubr.msk.f32.mxu0 %vm5014_vm9, %v5013_v2 }
 0x329   :  { %4491 = vmatpush3.xpose.msk.msra.mxu0 %vm404_vm10, %v784_v20  ;;  %4497 = vmatprep.mubr.msk.f32.mxu1 %vm5014_vm9, %v5013_v2 }
 0x32a   :  { %4500 = vmatprep.subr.mxu0 %v5013_v2  ;;  %4505 = vmatprep.subr.mxu1 %v5013_v2 }
 0x32b   :  { %4498 = vmatmul.mubr.msk.f32.vlgmr.msra.gmra.mrb[12].mxu1 %vm404_vm10, %v5316_v10 }
 0x32c   :  { %4493 = vmatmul.mubr.msk.f32.vlgmr.msra.gmra.mrb[8].mxu0 %vm404_vm10, %v5324_v13  ;;  %v936_v21 = vpop.permute.xlu1 %935  ;;  %4507 = vmatprep.mubr.msk.f32.mxu1 %vm5014_vm9, %v5013_v2 }
 0x32d   :  { %4501 = vmatpush3.xpose.msk.msra.mxu0 %vm404_vm10, %v936_v21  ;;  %4502 = vmatprep.mubr.msk.f32.mxu0 %vm5014_vm9, %v5013_v2 }
 0x32e   :  { %4510 = vmatprep.subr.mxu0 %v5013_v2 }
 0x330   :  { %4503 = vmatmul.mubr.msk.f32.vlgmr.msra.gmra.mrb[10].mxu0 %vm404_vm10, %v5334_v14 }
 0x331   :  { %4512 = vmatprep.mubr.msk.f32.mxu0 %vm5014_vm9, %v5013_v2 }
 0x38b   :  { %v475_v25 = vpop.f32.mrb[6].mxu1 }
 0x38c   :  { %v476_v26 = vadd.f32 %v475_v25, %v5387_v24  ;;  %v4469_v27 = vpop.f32.mrb[7].mxu1 }
 0x38e   :  { %v1011_v28 = vsel %vm404_vm10, %v476_v26, -inf }
 0x38f   :  { %1012 = vmax.xlane.f32.xlu0 %v1011_v28 }
 0x393   :  { %v551_v29 = vpop.f32.mrb[4].mxu0 }
 0x394   :  { %v552_v30 = vadd.f32 %v551_v29, %v5387_v24  ;;  %v4474_v31 = vpop.f32.mrb[5].mxu0 }
 0x396   :  { %v1014_v32 = vsel %vm404_vm10, %v552_v30, -inf }
 0x397   :  { %1015 = vmax.xlane.f32.xlu1 %v1014_v32 }
 0x3f6   :  { %v627_v33 = vpop.f32.mrb[8].mxu1 }
 0x3f7   :  { %v628_v34 = vadd.f32 %v627_v33, %v5387_v24  ;;  %v4479_v35 = vpop.f32.mrb[9].mxu1 }
 0x3f9   :  { %v1017_v36 = vsel %vm404_vm10, %v628_v34, -inf }
 0x3fa   :  { %1018 = vmax.xlane.f32.xlu0 %v1017_v36  ;;  %v703_v37 = vpop.f32.mrb[6].mxu0  ;;  %v779_v38 = vpop.f32.mrb[10].mxu1 }
 0x3fb   :  { %v704_v39 = vadd.f32 %v703_v37, %v5387_v24  ;;  %v780_v40 = vadd.f32 %v779_v38, %v5387_v24  ;;  %v4484_v41 = vpop.f32.mrb[7].mxu0  ;;  %v4489_v42 = vpop.f32.mrb[11].mxu1 }
 0x3fd   :  { %v1023_v43 = vsel %vm404_vm10, %v780_v40, -inf  ;;  %v1020_v44 = vsel %vm404_vm10, %v704_v39, -inf }
 0x3fe   :  { %v931_v45 = vpop.f32.mrb[12].mxu1  ;;  %1024 = vmax.xlane.f32.xlu1 %v1023_v43  ;;  %1021 = vmax.xlane.f32.xlu0 %v1020_v44 }
 0x3ff   :  { %v932_v46 = vadd.f32 %v931_v45, %v5387_v24  ;;  %v855_v47 = vpop.f32.mrb[8].mxu0  ;;  %v4499_v48 = vpop.f32.mrb[13].mxu1 }
 0x400   :  { %v856_v49 = vadd.f32 %v855_v47, %v5387_v24  ;;  %v4494_v50 = vpop.f32.mrb[9].mxu0 }
 0x401   :  { %v1029_v51 = vsel %vm404_vm10, %v932_v46, -inf }
 0x402   :  { %1030 = vmax.xlane.f32.xlu1 %v1029_v51  ;;  %v1026_v52 = vsel %vm404_vm10, %v856_v49, -inf }
 0x403   :  { %1027 = vmax.xlane.f32.xlu0 %v1026_v52  ;;  %v1007_v53 = vpop.f32.mrb[10].mxu0 }
 0x404   :  { %v1008_v54 = vadd.f32 %v1007_v53, %v5387_v24  ;;  %v4504_v55 = vpop.f32.mrb[11].mxu0 }
 0x406   :  { %v1032_v56 = vsel %vm404_vm10, %v1008_v54, -inf }
 0x407   :  { %1033 = vmax.xlane.f32.xlu0 %v1032_v56 }
 0x413   :  { %1099 = vrot.lane.b32.xlu1 %v5290_v6, %s5020_s27 }
 0x417   :  { %1251 = vrot.lane.b32.xlu1 %v5312_v9, %s5020_s27 }
 0x41b   :  { %1327 = vrot.lane.b32.xlu1 %v5318_v11, %s5020_s27 }
 0x41c   :  { %v1013_v58 = vpop.xlane.xlu0 %1012 }
 0x41d   :  { %1175 = vrot.lane.b32.xlu0 %v5296_v7, %s5020_s27  ;;  %v1035_v60 = vsub.f32 %v476_v26, %v1013_v58 }
 0x41f   :  { %1479 = vrot.lane.b32.xlu1 %v5324_v13, %s5020_s27  ;;  %v1043_v63 = vmul.f32 1.442695, %v1035_v60 }
 0x421   :  { %1403 = vrot.lane.b32.xlu0 %v5310_v8, %s5020_s27 }
 0x424   :  { %v1016_v57 = vpop.xlane.xlu1 %1015 }
 0x425   :  { %v1036_v59 = vsub.f32 %v552_v30, %v1016_v57 }
 0x427   :  { %v1045_v62 = vmul.f32 1.442695, %v1036_v59 }
 0x429   :  { %4895 = vpow2.f32 %v1045_v62 }
 0x42a   :  { %4897 = vpow2.f32 %v1043_v63 }
 0x433   :  { %v5417_v0 = vpop.eup %4895 }
 0x434   :  { %v5419_v3 = vpop.eup %4897  ;;  %v1062_v4 = vsel %vm404_vm10, %v5417_v0, 0.0 }
 0x435   :  { %v1059_v5 = vsel %vm404_vm10, %v5419_v3, 0.0 }
 0x440   :  { %1063 = vadd.xlane.f32.xlu0 %v1062_v4 }
 0x443   :  { %1060 = vadd.xlane.f32.xlu1 %v1059_v5 }
 0x487   :  { %v1019_v6 = vpop.xlane.xlu0 %1018 }
 0x488   :  { %v1037_v7 = vsub.f32 %v628_v34, %v1019_v6 }
 0x48a   :  { %v1047_v8 = vmul.f32 1.442695, %v1037_v7 }
 0x48b   :  { %v1022_v9 = vpop.xlane.xlu0 %1021  ;;  %v1025_v11 = vpop.xlane.xlu1 %1024 }
 0x48c   :  { %4899 = vpow2.f32 %v1047_v8  ;;  %v1038_v12 = vsub.f32 %v704_v39, %v1022_v9  ;;  %v1039_v13 = vsub.f32 %v780_v40, %v1025_v11 }
 0x48e   :  { %v1049_v15 = vmul.f32 1.442695, %v1038_v12  ;;  %v1051_v16 = vmul.f32 1.442695, %v1039_v13 }
 0x48f   :  { %v1031_v17 = vpop.xlane.xlu1 %1030 }
 0x490   :  { %4901 = vpow2.f32 %v1049_v15  ;;  %v1028_v18 = vpop.xlane.xlu0 %1027  ;;  %v1041_v19 = vsub.f32 %v932_v46, %v1031_v17  ;;  %v278_v15 = vld [vmem:[%s5961_s2 + $0x20] sm:$0xff] }
 0x491   :  { %4903 = vpow2.f32 %v1051_v16  ;;  %v1040_v20 = vsub.f32 %v856_v49, %v1028_v18  ;;  %v279_v16 = vld [vmem:[%s5961_s2 + $0x28] sm:$0xff]  ;;  %v280_v18 = vld [vmem:[%s5961_s2 + $0x30] sm:$0xff] }
 0x492   :  { %v1055_v21 = vmul.f32 1.442695, %v1041_v19  ;;  %v4790_v17 = vpack.c.bf16 %v279_v16, %v278_v15  ;;  %v281_v19 = vld [vmem:[%s5961_s2 + $0x38] sm:$0xff]  ;;  %v4203_v16 = vld [vmem:[%s5961_s2 + $0xa2] ss:$0 sm:$0xff] }
 0x493   :  { %v1053_v23 = vmul.f32 1.442695, %v1040_v20  ;;  %v1100_v25 = vpop.permute.xlu1 %1099  ;;  %v4794_v20 = vpack.c.bf16 %v281_v19, %v280_v18  ;;  %v4204_v18 = vld [vmem:[%s5961_s2 + $0xa3] ss:$0 sm:$0xff] }
 0x494   :  { %4905 = vpow2.f32 %v1055_v21  ;;  %v1034_v26 = vpop.xlane.xlu0 %1033  ;;  %4506 = vmatpush3.msra.mxu1 %v1100_v25 }
 0x495   :  { %4907 = vpow2.f32 %v1053_v23  ;;  %v1042_v27 = vsub.f32 %v1008_v54, %v1034_v26  ;;  %4515 = vmatprep.subr.mxu1 %v5013_v2 }
 0x496   :  { %v4900_v28 = vpop.eup %4899 }
 0x497   :  { %v1057_v29 = vmul.f32 1.442695, %v1042_v27  ;;  %v1065_v30 = vsel %vm404_vm10, %v4900_v28, 0.0  ;;  %v1252_v42 = vpop.permute.xlu1 %1251 }
 0x498   :  { %v1176_v31 = vpop.permute.xlu0 %1175  ;;  %1066 = vadd.xlane.f32.xlu1 %v1065_v30 }
 0x499   :  { %4909 = vpow2.f32 %v1057_v29  ;;  %4511 = vmatpush3.msra.mxu0 %v1176_v31 }
 0x49a   :  { %v4902_v32 = vpop.eup %4901  ;;  %4520 = vmatprep.subr.mxu0 %v5013_v2 }
 0x49b   :  { %v4904_v33 = vpop.eup %4903  ;;  %v1068_v34 = vsel %vm404_vm10, %v4902_v32, 0.0  ;;  %v1328_v43 = vpop.permute.xlu1 %1327 }
 0x49c   :  { %1069 = vadd.xlane.f32.xlu0 %v1068_v34  ;;  %v1071_v35 = vsel %vm404_vm10, %v4904_v33, 0.0  ;;  %v1404_v44 = vpop.permute.xlu0 %1403 }
 0x49d   :  { %1072 = vadd.xlane.f32.xlu1 %v1071_v35 }
 0x49e   :  { %v5430_v36 = vpop.eup %4905 }
 0x49f   :  { %v4908_v37 = vpop.eup %4907  ;;  %v1077_v38 = vsel %vm404_vm10, %v5430_v36, 0.0  ;;  %v1480_v45 = vpop.permute.xlu1 %1479 }
 0x4a0   :  { %v1074_v39 = vsel %vm404_vm10, %v4908_v37, 0.0 }
 0x4a1   :  { %1075 = vadd.xlane.f32.xlu0 %v1074_v39  ;;  %1078 = vadd.xlane.f32.xlu1 %v1077_v38 }
 0x4a3   :  { %v5435_v40 = vpop.eup %4909 }
 0x4a4   :  { %v1080_v41 = vsel %vm404_vm10, %v5435_v40, 0.0 }
 0x4a5   :  { %1081 = vadd.xlane.f32.xlu0 %v1080_v41 }
 0x4b2   :  { %1631 = vrot.lane.b32.xlu1 %v5334_v14, %s5020_s27 }
 0x4bb   :  { %1555 = vrot.lane.b32.xlu0 %v5316_v10, %s5020_s27 }
 0x4cd   :  { %v1064_v46 = vpop.xlane.xlu0 %1063 }
 0x4ce   :  { %4911 = vrcp.f32 %v1064_v46 }
 0x4d0   :  { %v1061_v47 = vpop.xlane.xlu1 %1060 }
 0x4d1   :  { %4913 = vrcp.f32 %v1061_v47  ;;  %v4200_v47 = vld [vmem:[%s5961_s2 + $0xa1] ss:$0 sm:$0xff] }
 0x4d8   :  { %v4912_v48 = vpop.eup %4911 }
 0x4d9   :  { %v1086_v49 = vmul.f32 %v4912_v48, %v5417_v0 }
 0x4db   :  { %v4914_v50 = vpop.eup %4913  ;;  %4513 = vmatmul.mubr.msk.f32.vlgmr.msra.gmra.mrb[12].mxu0 %vm404_vm10, %v1086_v49 }
 0x4dc   :  { %v1084_v51 = vmul.f32 %v4914_v50, %v5419_v3  ;;  %4521 = vmatpush3.msra.mxu0 %v1328_v43  ;;  %4522 = vmatprep.mubr.msk.f32.mxu0 %vm5014_vm9, %v5013_v2 }
 0x4dd   :  { %4530 = vmatprep.subr.mxu0 %v5013_v2 }
 0x4de   :  { %4508 = vmatmul.mubr.msk.f32.vlgmr.msra.gmra.mrb[14].mxu1 %vm404_vm10, %v1084_v51 }
 0x4df   :  { %4516 = vmatpush3.msra.mxu1 %v1252_v42  ;;  %4517 = vmatprep.mubr.msk.f32.mxu1 %vm5014_vm9, %v5013_v2 }
 0x4e0   :  { %4525 = vmatprep.subr.mxu1 %v5013_v2 }
 0x525   :  { %v1067_v10 = vpop.xlane.xlu1 %1066 }
 0x526   :  { %4915 = vrcp.f32 %v1067_v10 }
 0x529   :  { %v1070_v14 = vpop.xlane.xlu0 %1069 }
 0x52a   :  { %4917 = vrcp.f32 %v1070_v14  ;;  %v1073_v52 = vpop.xlane.xlu1 %1072 }
 0x52b   :  { %4919 = vrcp.f32 %v1073_v52 }
 0x52e   :  { %v1076_v53 = vpop.xlane.xlu0 %1075  ;;  %v1079_v54 = vpop.xlane.xlu1 %1078 }
 0x52f   :  { %4921 = vrcp.f32 %v1076_v53 }
 0x530   :  { %v4916_v55 = vpop.eup %4915  ;;  %4923 = vrcp.f32 %v1079_v54 }
 0x531   :  { %v1088_v56 = vmul.f32 %v4916_v55, %v4900_v28 }
 0x532   :  { %v1082_v57 = vpop.xlane.xlu0 %1081  ;;  %v1632_v6 = vpop.permute.xlu1 %1631 }
 0x533   :  { %4925 = vrcp.f32 %v1082_v57  ;;  %4518 = vmatmul.mubr.msk.f32.vlgmr.msra.gmra.mrb[16].mxu1 %vm404_vm10, %v1088_v56 }
 0x534   :  { %v4918_v58 = vpop.eup %4917  ;;  %4526 = vmatpush3.msra.mxu1 %v1404_v44  ;;  %4527 = vmatprep.mubr.msk.f32.mxu1 %vm5014_vm9, %v5013_v2 }
 0x535   :  { %v4920_v59 = vpop.eup %4919  ;;  %v1090_v60 = vmul.f32 %v4918_v58, %v4902_v32  ;;  %4535 = vmatprep.subr.mxu1 %v5013_v2 }
 0x536   :  { %v1092_v62 = vmul.f32 %v4920_v59, %v4904_v33  ;;  %v1556_v63 = vpop.permute.xlu0 %1555 }
 0x537   :  { %4523 = vmatmul.mubr.msk.f32.vlgmr.msra.gmra.mrb[14].mxu0 %vm404_vm10, %v1090_v60 }
 0x538   :  { %4528 = vmatmul.mubr.msk.f32.vlgmr.msra.gmra.mrb[18].mxu1 %vm404_vm10, %v1092_v62  ;;  %4531 = vmatpush3.msra.mxu0 %v1480_v45 }
 0x539   :  { %v4922_v0 = vpop.eup %4921  ;;  %4536 = vmatpush3.msra.mxu1 %v1556_v63  ;;  %4532 = vmatprep.mubr.msk.f32.mxu0 %vm5014_vm9, %v5013_v2  ;;  %v282_v63 = vld [vmem:[%s5961_s2 + $0x40] sm:$0xff] }
 0x53a   :  { %v4924_v3 = vpop.eup %4923  ;;  %v1094_v4 = vmul.f32 %v4922_v0, %v4908_v37  ;;  %4537 = vmatprep.mubr.msk.f32.mxu1 %vm5014_vm9, %v5013_v2  ;;  %4540 = vmatprep.subr.mxu0 %v5013_v2  ;;  %v283_v0 = vld [vmem:[%s5961_s2 + $0x48] sm:$0xff] }
 0x53b   :  { %v1096_v5 = vmul.f32 %v4924_v3, %v5430_v36  ;;  %4791 = vmatprep.subr.bf16.mxu1 %v4790_v17  ;;  %v4798_v3 = vpack.c.bf16 %v283_v0, %v282_v63 }
 0x53c   :  { %4533 = vmatmul.mubr.msk.f32.vlgmr.msra.gmra.mrb[16].mxu0 %vm404_vm10, %v1094_v4  ;;  %v284_v4 = vld [vmem:[%s5961_s2 + $0x50] sm:$0xff] }
 0x53d   :  { %v4926_v7 = vpop.eup %4925  ;;  %4538 = vmatmul.mubr.msk.f32.vlgmr.msra.gmra.mrb[20].mxu1 %vm404_vm10, %v1096_v5  ;;  %4541 = vmatpush3.msra.mxu0 %v1632_v6  ;;  %v285_v5 = vld [vmem:[%s5961_s2 + $0x58] sm:$0xff] }
 0x53e   :  { %v1098_v8 = vmul.f32 %v4926_v7, %v5435_v40  ;;  %4542 = vmatprep.mubr.msk.f32.mxu0 %vm5014_vm9, %v5013_v2  ;;  %4793 = vmatpush3.bf16.msra.mxu1 %v4790_v17  ;;  %v4802_v6 = vpack.c.bf16 %v285_v5, %v284_v4 }
 0x53f   :  { %4795 = vmatprep.subr.bf16.mxu1 %v4794_v20  ;;  %4799 = vmatprep.subr.bf16.mxu0 %v4798_v3 }
 0x540   :  { %4543 = vmatmul.mubr.msk.f32.vlgmr.msra.gmra.mrb[18].mxu0 %vm404_vm10, %v1098_v8 }
 0x541   :  { %4801 = vmatpush3.bf16.msra.mxu0 %v4798_v3 }
 0x542   :  { %4797 = vmatpush3.bf16.msra.mxu1 %v4794_v20  ;;  %4803 = vmatprep.subr.bf16.mxu0 %v4802_v6 }
 0x545   :  { %4805 = vmatpush3.bf16.msra.mxu0 %v4802_v6 }
 0x5ae   :  { %v1247_v9 = vpop.f32.mrb[12].mxu0 }
 0x5af   :  { %v4514_v11 = vpop.f32.mrb[13].mxu0 }
 0x5b1   :  { %v1171_v12 = vpop.f32.mrb[14].mxu1 }
 0x5b2   :  { %v4509_v13 = vpop.f32.mrb[15].mxu1 }
 0x606   :  { %v1323_v21 = vpop.f32.mrb[16].mxu1 }
 0x607   :  { %1709 = vrot.lane.b32.xlu0 %v1323_v21, %s5021_s9  ;;  %v4519_v23 = vpop.f32.mrb[17].mxu1 }
 0x60a   :  { %v1399_v25 = vpop.f32.mrb[14].mxu0 }
 0x60b   :  { %v1475_v26 = vpop.f32.mrb[18].mxu1  ;;  %1711 = vrot.lane.b32.xlu1 %v1399_v25, %s5021_s9  ;;  %v4524_v27 = vpop.f32.mrb[15].mxu0 }
 0x60c   :  { %1717 = vrot.lane.b32.xlu0 %v1475_v26, %s5022_s10  ;;  %v4529_v28 = vpop.f32.mrb[19].mxu1 }
 0x60f   :  { %v1551_v29 = vpop.f32.mrb[16].mxu0 }
 0x610   :  { %v1627_v30 = vpop.f32.mrb[20].mxu1  ;;  %1719 = vrot.lane.b32.xlu1 %v1551_v29, %s5022_s10  ;;  %v4534_v31 = vpop.f32.mrb[17].mxu0  ;;  %v286_v29 = vld [vmem:[%s5961_s2 + $0x60] sm:$0xff] }
 0x611   :  { %1725 = vrot.lane.b32.xlu0 %v1627_v30, %s5023_s11  ;;  %v4539_v32 = vpop.f32.mrb[21].mxu1  ;;  %v287_v30 = vld [vmem:[%s5961_s2 + $0x68] sm:$0xff]  ;;  %v288_v31 = vld [vmem:[%s5961_s2 + $0x70] sm:$0xff] }
 0x613   :  { %v1703_v33 = vpop.f32.mrb[18].mxu0 }
 0x614   :  { %1727 = vrot.lane.b32.xlu1 %v1703_v33, %s5023_s11  ;;  %v4544_v34 = vpop.f32.mrb[19].mxu0  ;;  %v290_v33 = vld [vmem:[%s5961_s2 + $0x80] sm:$0xff] }
 0x615   :  { %v291_v34 = vld [vmem:[%s5961_s2 + $0x88] sm:$0xff] }
 0x679   :  { %v1710_v35 = vpop.permute.xlu0 %1709 }
 0x67a   :  { %v1731_v38 = vsel %vm404_vm10, %v1171_v12, %v1710_v35  ;;  %v4814_v35 = vpack.c.bf16 %v291_v34, %v290_v33  ;;  %v4211_v33 = vld [vmem:[%s5961_s2 + $0xa6] ss:$0 sm:$0xff] }
 0x67d   :  { %v1712_v36 = vpop.permute.xlu1 %1711 }
 0x67e   :  { %v1718_v37 = vpop.permute.xlu0 %1717  ;;  %v1732_v43 = vsel %vm404_vm10, %v1247_v9, %v1712_v36  ;;  %v292_v36 = vld [vmem:[%s5961_s2 + $0x90] sm:$0xff] }
 0x67f   :  { %v1734_v40 = vsel %vm1733_vm12, %v1731_v38, %v1718_v37  ;;  %v293_v37 = vld [vmem:[%s5961_s2 + $0x98] sm:$0xff] }
 0x680   :  { %v4818_v38 = vpack.c.bf16 %v293_v37, %v292_v36  ;;  %v4212_v37 = vld [vmem:[%s5961_s2 + $0xa7] ss:$0 sm:$0xff] }
 0x682   :  { %v1720_v39 = vpop.permute.xlu1 %1719 }
 0x683   :  { %v1726_v41 = vpop.permute.xlu0 %1725  ;;  %v1735_v44 = vsel %vm1733_vm12, %v1732_v43, %v1720_v39  ;;  %v4205_v39 = vld [vmem:[%s5961_s2 + $0xa4] ss:$0 sm:$0xff] }
 0x684   :  { %v1737_v42 = vsel %vm1736_vm13, %v1734_v40, %v1726_v41 }
 0x685   :  { %4553 = vmatprep.mubr.msk.f32.mxu1 %vm306_vm8, %v1737_v42 }
 0x686   :  { %v1728_v45 = vpop.permute.xlu1 %1727 }
 0x687   :  { %v1738_v46 = vsel %vm1736_vm13, %v1735_v44, %v1728_v45 }
 0x688   :  { %4554 = vmatmul.mubr.msk.f32.vlgmr.msra.gmra.mrb[22].mxu1 %vm306_vm8, %v1738_v46 }
 0x75b   :  { %v4555_v48 = vpop.f32.mrb[22].mxu1 }
 0x75c   :  { %v1821_v49 = vadd.f32 %v4555_v48, %v4200_v47  ;;  %v1815_v50 = vpop.f32.mrb[23].mxu1 }
 0x75d   :  { %v1816_v51 = vadd.f32 %v4200_v47, %v1815_v50 }
 0x75e   :  { %v1827_v10 = vsel %vm306_vm8, %v1821_v49, 0.0 }
 0x75f   :  { %1828 = vadd.xlane.f32.xlu1 %v1827_v10  ;;  %v1824_v14 = vsel %vm306_vm8, %v1816_v51, 0.0 }
 0x760   :  { %1825 = vadd.xlane.f32.xlu0 %v1824_v14 }
 0x7ec   :  { %v1829_v52 = vpop.xlane.xlu1 %1828 }
 0x7ed   :  { %v1832_v53 = vmul.f32 0.03125, %v1829_v52  ;;  %v1826_v54 = vpop.xlane.xlu0 %1825 }
 0x7ee   :  { %v1831_v55 = vmul.f32 0.03125, %v1826_v54 }
 0x7ef   :  { %v1834_v56 = vsub.f32 %v1821_v49, %v1832_v53 }
 0x7f0   :  { %v1833_v57 = vsub.f32 %v1816_v51, %v1831_v55 }
 0x7f1   :  { %v1836_v60 = vmul.f32 %v1834_v56, %v1834_v56 }
 0x7f2   :  { %v1835_v58 = vmul.f32 %v1833_v57, %v1833_v57 }
 0x7f3   :  { %v1840_v62 = vsel %vm306_vm8, %v1836_v60, 0.0  ;;  %v4208_v60 = vld [vmem:[%s5961_s2 + $0xa5] ss:$0 sm:$0xff] }
 0x7f4   :  { %v1837_v59 = vsel %vm306_vm8, %v1835_v58, 0.0 }
 0x7f5   :  { %1838 = vadd.xlane.f32.xlu0 %v1837_v59 }
 0x7f9   :  { %1841 = vadd.xlane.f32.xlu0 %v1840_v62 }
 0x882   :  { %v1839_v7 = vpop.xlane.xlu0 %1838 }
 0x883   :  { %v1843_v8 = vmul.f32 0.03125, %v1839_v7 }
 0x885   :  { %v1845_v9 = vadd.f32 1e-05, %v1843_v8 }
 0x886   :  { %v1842_v11 = vpop.xlane.xlu0 %1841 }
 0x887   :  { %4927 = vrsqrt.f32 %v1845_v9  ;;  %v1844_v12 = vmul.f32 0.03125, %v1842_v11 }
 0x889   :  { %v1846_v13 = vadd.f32 1e-05, %v1844_v12 }
 0x88b   :  { %4929 = vrsqrt.f32 %v1846_v13 }
 0x891   :  { %v4928_v15 = vpop.eup %4927 }
 0x892   :  { %v1849_v17 = vmul.f32 %v4928_v15, %v1833_v57 }
 0x894   :  { %v1855_v19 = vmul.f32 %v4203_v16, %v1849_v17 }
 0x895   :  { %v4930_v20 = vpop.eup %4929 }
 0x896   :  { %v1850_v21 = vmul.f32 %v4930_v20, %v1834_v56  ;;  %v1861_v23 = vadd.f32 %v4204_v18, %v1855_v19  ;;  %v2095_v19 = vld [vmem:[%s5961_s2 + $0xb0] sm:$0xff] }
 0x898   :  { %v1856_v25 = vmul.f32 %v4203_v16, %v1850_v21  ;;  %v5523_v26 = vadd.f32 %v1861_v23, %v5273_v61  ;;  %v4806_v61 = vpack.c.bf16 %v287_v30, %v286_v29  ;;  %v2096_v21 = vld [vmem:[%s5961_s2 + $0xb8] sm:$0xff]  ;;  %v2097_v23 = vld [vmem:[%s5961_s2 + $0xc0] sm:$0xff] }
 0x89a   :  { %v1862_v27 = vadd.f32 %v4204_v18, %v1856_v25  ;;  %4564 = vmatprep.mubr.msk.f32.mxu0 %vm306_vm8, %v5523_v26  ;;  %4807 = vmatprep.subr.bf16.mxu1 %v4806_v61  ;;  %v2094_v18 = vld [vmem:[%s5961_s2 + $0xa8] sm:$0xff]  ;;  %v4826_v25 = vpack.c.bf16 %v2097_v23, %v2096_v21 }
 0x89b   :  { %4809 = vmatpush3.bf16.msra.mxu1 %v4806_v61  ;;  %v4822_v20 = vpack.c.bf16 %v2095_v19, %v2094_v18 }
 0x89c   :  { %v5528_v28 = vadd.f32 %v1862_v27, %v5277_v1  ;;  %v289_v1 = vld [vmem:[%s5961_s2 + $0x78] sm:$0xff] }
 0x89d   :  { %v4810_v32 = vpack.c.bf16 %v289_v1, %v288_v31  ;;  %4823 = vmatprep.subr.bf16.mxu0 %v4822_v20 }
 0x89e   :  { %4565 = vmatmul.mubr.msk.f32.vlgmr.msra.gmra.mrb[20].mxu0 %vm306_vm8, %v5528_v28 }
 0x89f   :  { %4811 = vmatprep.subr.bf16.mxu1 %v4810_v32  ;;  %4825 = vmatpush3.bf16.msra.mxu0 %v4822_v20 }
 0x8a0   :  { %4813 = vmatpush3.bf16.msra.mxu1 %v4810_v32  ;;  %4827 = vmatprep.subr.bf16.mxu0 %v4826_v25 }
 0x8a1   :  { %4815 = vmatprep.subr.bf16.mxu1 %v4814_v35 }
 0x8a3   :  { %4829 = vmatpush3.bf16.msra.mxu0 %v4826_v25 }
 0x8a4   :  { %4817 = vmatpush3.bf16.msra.mxu1 %v4814_v35  ;;  %4597 = vmatprep.subr.mxu0 %v5013_v2 }
 0x8a5   :  { %4819 = vmatprep.subr.bf16.mxu1 %v4818_v38 }
 0x8a8   :  { %4821 = vmatpush3.bf16.msra.mxu1 %v4818_v38 }
 0x8a9   :  { %4607 = vmatprep.subr.mxu1 %v5013_v2 }
 0x971   :  { %v4566_v40 = vpop.f32.mrb[20].mxu0 }
 0x972   :  { %v1947_v41 = vadd.f32 %v4566_v40, %v4205_v39  ;;  %v1941_v42 = vpop.f32.mrb[21].mxu0 }
 0x973   :  { %v1942_v43 = vadd.f32 %v4205_v39, %v1941_v42 }
 0x974   :  { %v1953_v44 = vmul.f32 0.044715, %v1947_v41  ;;  %v1951_v57 = vmul.f32 0.5, %v1947_v41 }
 0x975   :  { %v1952_v45 = vmul.f32 0.044715, %v1942_v43  ;;  %v1950_v55 = vmul.f32 0.5, %v1942_v43 }
 0x976   :  { %v1955_v46 = vmul.f32 %v1953_v44, %v1947_v41  ;;  %v4213_v44 = vld [vmem:[%s5961_s2 + $0x148] ss:$0 sm:$0xff] }
 0x977   :  { %v1954_v47 = vmul.f32 %v1952_v45, %v1942_v43 }
 0x978   :  { %v1957_v48 = vmul.f32 %v1955_v46, %v1947_v41 }
 0x979   :  { %v1956_v49 = vmul.f32 %v1954_v47, %v1942_v43 }
 0x97a   :  { %v1959_v50 = vadd.f32 %v1957_v48, %v1947_v41 }
 0x97b   :  { %v1958_v51 = vadd.f32 %v1956_v49, %v1942_v43 }
 0x97c   :  { %v1961_v10 = vmul.f32 0.7978846, %v1959_v50 }
 0x97d   :  { %v1960_v14 = vmul.f32 0.7978846, %v1958_v51 }
 0x97e   :  { %4931 = vtanh.f32 %v1961_v10 }
 0x97f   :  { %4933 = vtanh.f32 %v1960_v14 }
 0x988   :  { %v4932_v52 = vpop.eup %4931 }
 0x989   :  { %v4934_v53 = vpop.eup %4933  ;;  %v1965_v54 = vadd.f32 1.0, %v4932_v52 }
 0x98a   :  { %v1964_v56 = vadd.f32 1.0, %v4934_v53 }
 0x98b   :  { %v1967_v59 = vmul.f32 %v1965_v54, %v1951_v57 }
 0x98c   :  { %v1966_v58 = vmul.f32 %v1964_v56, %v1950_v55 }
 0x98e   :  { %4583 = vmatprep.mubr.msk.f32.mxu1 %vm1972_vm14, %v1966_v58 }
 0x98f   :  { %4584 = vmatmul.mubr.msk.f32.vlgmr.msra.gmra.mrb[24].mxu1 %vm1972_vm14, %v1967_v59 }
 0x990   :  { %4609 = vmatprep.mubr.msk.f32.mxu1 %vm5014_vm9, %v5013_v2 }
 0xa62   :  { %v4585_v62 = vpop.f32.mrb[24].mxu1 }
 0xa63   :  { %v2051_v63 = vadd.f32 %v4585_v62, %v4208_v60  ;;  %v2045_v0 = vpop.f32.mrb[25].mxu1 }
 0xa64   :  { %v2046_v3 = vadd.f32 %v4208_v60, %v2045_v0 }
 0xa65   :  { %v2057_v4 = vsel %vm306_vm8, %v2051_v63, 0.0 }
 0xa66   :  { %2058 = vadd.xlane.f32.xlu0 %v2057_v4  ;;  %v2054_v5 = vsel %vm306_vm8, %v2046_v3, 0.0 }
 0xa67   :  { %2055 = vadd.xlane.f32.xlu1 %v2054_v5 }
 0xaf3   :  { %v2059_v6 = vpop.xlane.xlu0 %2058 }
 0xaf4   :  { %v2061_v7 = vmul.f32 0.03125, %v2059_v6  ;;  %v2056_v8 = vpop.xlane.xlu1 %2055 }
 0xaf5   :  { %v2060_v9 = vmul.f32 0.03125, %v2056_v8 }
 0xaf6   :  { %v2063_v11 = vsub.f32 %v2051_v63, %v2061_v7 }
 0xaf7   :  { %v2062_v12 = vsub.f32 %v2046_v3, %v2060_v9 }
 0xaf8   :  { %v2065_v13 = vmul.f32 %v2063_v11, %v2063_v11 }
 0xaf9   :  { %v2064_v15 = vmul.f32 %v2062_v12, %v2062_v12 }
 0xafa   :  { %v2069_v16 = vsel %vm306_vm8, %v2065_v13, 0.0 }
 0xafb   :  { %2070 = vadd.xlane.f32.xlu0 %v2069_v16  ;;  %v2066_v17 = vsel %vm306_vm8, %v2064_v15, 0.0 }
 0xafc   :  { %2067 = vadd.xlane.f32.xlu1 %v2066_v17 }
 0xb88   :  { %v2071_v27 = vpop.xlane.xlu0 %2070 }
 0xb89   :  { %v2073_v29 = vmul.f32 0.03125, %v2071_v27  ;;  %v2068_v30 = vpop.xlane.xlu1 %2067 }
 0xb8a   :  { %v2072_v61 = vmul.f32 0.03125, %v2068_v30 }
 0xb8b   :  { %v2075_v31 = vadd.f32 1e-05, %v2073_v29 }
 0xb8c   :  { %v2074_v1 = vadd.f32 1e-05, %v2072_v61 }
 0xb8d   :  { %4935 = vrsqrt.f32 %v2075_v31 }
 0xb8e   :  { %4937 = vrsqrt.f32 %v2074_v1 }
 0xb97   :  { %v4936_v32 = vpop.eup %4935 }
 0xb98   :  { %v4938_v34 = vpop.eup %4937  ;;  %v2079_v35 = vmul.f32 %v4936_v32, %v2063_v11 }
 0xb99   :  { %v2078_v36 = vmul.f32 %v4938_v34, %v2062_v12 }
 0xb9a   :  { %v2085_v38 = vmul.f32 %v4211_v33, %v2079_v35 }
 0xb9b   :  { %v2084_v39 = vmul.f32 %v4211_v33, %v2078_v36 }
 0xb9c   :  { %v2091_v40 = vadd.f32 %v4212_v37, %v2085_v38 }
 0xb9d   :  { %v2090_v41 = vadd.f32 %v4212_v37, %v2084_v39 }
 0xb9e   :  { %v5594_v43 = vadd.f32 %v2091_v40, %v5528_v28 }
 0xb9f   :  { %v5591_v42 = vadd.f32 %v2090_v41, %v5523_v26 }
 0xba1   :  { %4594 = vmatprep.mubr.msk.f32.mxu0 %vm306_vm8, %v5591_v42 }
 0xba2   :  { %4595 = vmatmul.mubr.msk.f32.vlgmr.msra.gmra.mrb[22].mxu0 %vm306_vm8, %v5594_v43 }
 0xba3   :  { %4599 = vmatprep.mubr.msk.f32.mxu0 %vm5014_vm9, %v5013_v2 }
 0xc75   :  { %v4596_v45 = vpop.f32.mrb[22].mxu0 }
 0xc76   :  { %v5605_v46 = vadd.f32 %v4596_v45, %v4213_v44  ;;  %v2198_v26 = vpop.f32.mrb[23].mxu0 }
 0xc77   :  { %v5607_v47 = vadd.f32 %v4213_v44, %v2198_v26 }
 0xc78   :  { %2211 = vrot.lane.b32.xlu0 %v5605_v46, %s5016_s24 }
 0xc79   :  { %2209 = vrot.lane.b32.xlu1 %v5607_v47, %s5016_s24 }
 0xc7c   :  { %2217 = vrot.lane.b32.xlu0 %v5607_v47, %s5017_s25 }
 0xc7d   :  { %2213 = vrot.lane.b32.xlu1 %v5607_v47, %s5015_s23 }
 0xc80   :  { %2221 = vrot.lane.b32.xlu0 %v5607_v47, %s5018_s26 }
 0xc81   :  { %2215 = vrot.lane.b32.xlu1 %v5605_v46, %s5015_s23 }
 0xc85   :  { %2219 = vrot.lane.b32.xlu1 %v5605_v46, %s5017_s25 }
 0xc89   :  { %2297 = vrot.lane.b32.xlu1 %v5605_v46, %s5018_s26 }
 0xcea   :  { %v5625_v28 = vpop.permute.xlu0 %2211 }
 0xceb   :  { %2449 = vrot.lane.b32.xlu1 %v5625_v28, %s5018_s26  ;;  %v5629_v48 = vpop.permute.xlu1 %2209 }
 0xcec   :  { %2373 = vrot.lane.b32.xlu0 %v5629_v48, %s5018_s26 }
 0xcee   :  { %v5633_v49 = vpop.permute.xlu0 %2217 }
 0xcef   :  { %v5635_v50 = vpop.permute.xlu1 %2213 }
 0xcf0   :  { %2525 = vrot.lane.b32.xlu0 %v5635_v50, %s5018_s26 }
 0xcf2   :  { %v2222_v51 = vpop.permute.xlu0 %2221 }
 0xcf3   :  { %4598 = vmatpush3.xpose.msk.msra.mxu0 %vm404_vm10, %v2222_v51  ;;  %v5640_v10 = vpop.permute.xlu1 %2215 }
 0xcf4   :  { %2677 = vrot.lane.b32.xlu0 %v5633_v49, %s5018_s26  ;;  %2601 = vrot.lane.b32.xlu1 %v5640_v10, %s5018_s26 }
 0xcf5   :  { %4602 = vmatprep.subr.mxu0 %v5013_v2 }
 0xcf6   :  { %4600 = vmatmul.mubr.msk.f32.vlgmr.msra.gmra.mrb[24].mxu0 %vm404_vm10, %v5607_v47 }
 0xcf7   :  { %v5649_v14 = vpop.permute.xlu1 %2219  ;;  %4604 = vmatprep.mubr.msk.f32.mxu0 %vm5014_vm9, %v5013_v2 }
 0xcf8   :  { %2753 = vrot.lane.b32.xlu1 %v5649_v14, %s5018_s26 }
 0xcfb   :  { %v2298_v52 = vpop.permute.xlu1 %2297 }
 0xcfc   :  { %4603 = vmatpush3.xpose.msk.msra.mxu0 %vm404_vm10, %v2298_v52 }
 0xcfd   :  { %4612 = vmatprep.subr.mxu0 %v5013_v2 }
 0xcff   :  { %4605 = vmatmul.mubr.msk.f32.vlgmr.msra.gmra.mrb[26].mxu0 %vm404_vm10, %v5605_v46 }
 0xd00   :  { %4614 = vmatprep.mubr.msk.f32.mxu0 %vm5014_vm9, %v5013_v2 }
 0xd5d   :  { %v2450_v53 = vpop.permute.xlu1 %2449 }
 0xd5e   :  { %v2374_v54 = vpop.permute.xlu0 %2373  ;;  %4613 = vmatpush3.xpose.msk.msra.mxu0 %vm404_vm10, %v2450_v53 }
 0xd5f   :  { %4608 = vmatpush3.xpose.msk.msra.mxu1 %vm404_vm10, %v2374_v54  ;;  %4622 = vmatprep.subr.mxu0 %v5013_v2 }
 0xd60   :  { %4617 = vmatprep.subr.mxu1 %v5013_v2 }
 0xd61   :  { %4615 = vmatmul.mubr.msk.f32.vlgmr.msra.gmra.mrb[28].mxu0 %vm404_vm10, %v5625_v28 }
 0xd62   :  { %4610 = vmatmul.mubr.msk.f32.vlgmr.msra.gmra.mrb[26].mxu1 %vm404_vm10, %v5629_v48  ;;  %v2526_v55 = vpop.permute.xlu0 %2525  ;;  %4624 = vmatprep.mubr.msk.f32.mxu0 %vm5014_vm9, %v5013_v2 }
 0xd63   :  { %4618 = vmatpush3.xpose.msk.msra.mxu1 %vm404_vm10, %v2526_v55  ;;  %4619 = vmatprep.mubr.msk.f32.mxu1 %vm5014_vm9, %v5013_v2 }
 0xd64   :  { %4627 = vmatprep.subr.mxu1 %v5013_v2 }
 0xd66   :  { %4620 = vmatmul.mubr.msk.f32.vlgmr.msra.gmra.mrb[28].mxu1 %vm404_vm10, %v5635_v50  ;;  %v2678_v56 = vpop.permute.xlu0 %2677  ;;  %v2602_v57 = vpop.permute.xlu1 %2601 }
 0xd67   :  { %4623 = vmatpush3.xpose.msk.msra.mxu0 %vm404_vm10, %v2602_v57  ;;  %4628 = vmatpush3.xpose.msk.msra.mxu1 %vm404_vm10, %v2678_v56 }
 0xd68   :  { %4629 = vmatprep.mubr.msk.f32.mxu1 %vm5014_vm9, %v5013_v2  ;;  %4632 = vmatprep.subr.mxu0 %v5013_v2 }
 0xd69   :  { %4637 = vmatprep.subr.mxu1 %v5013_v2 }
 0xd6a   :  { %4625 = vmatmul.mubr.msk.f32.vlgmr.msra.gmra.mrb[30].mxu0 %vm404_vm10, %v5640_v10  ;;  %4630 = vmatmul.mubr.msk.f32.vlgmr.msra.gmra.mrb[30].mxu1 %vm404_vm10, %v5633_v49  ;;  %v2754_v58 = vpop.permute.xlu1 %2753 }
 0xd6b   :  { %4633 = vmatpush3.xpose.msk.msra.mxu0 %vm404_vm10, %v2754_v58  ;;  %4634 = vmatprep.mubr.msk.f32.mxu0 %vm5014_vm9, %v5013_v2 }
 0xd6c   :  { %4642 = vmatprep.subr.mxu0 %v5013_v2  ;;  %4639 = vmatprep.mubr.msk.f32.mxu1 %vm5014_vm9, %v5013_v2 }
 0xd6e   :  { %4635 = vmatmul.mubr.msk.f32.vlgmr.msra.gmra.mrb[32].mxu0 %vm404_vm10, %v5649_v14 }
 0xd6f   :  { %4644 = vmatprep.mubr.msk.f32.mxu0 %vm5014_vm9, %v5013_v2 }
 0xdc9   :  { %v2293_v59 = vpop.f32.mrb[24].mxu0 }
 0xdca   :  { %v2294_v60 = vadd.f32 %v2293_v59, %v5387_v24  ;;  %v4601_v62 = vpop.f32.mrb[25].mxu0 }
 0xdcc   :  { %v2829_v63 = vsel %vm404_vm10, %v2294_v60, -inf }
 0xdcd   :  { %2830 = vmax.xlane.f32.xlu0 %v2829_v63 }
 0xdd2   :  { %v2369_v0 = vpop.f32.mrb[26].mxu0 }
 0xdd3   :  { %v2370_v3 = vadd.f32 %v2369_v0, %v5387_v24  ;;  %v4606_v4 = vpop.f32.mrb[27].mxu0 }
 0xdd5   :  { %v2832_v5 = vsel %vm404_vm10, %v2370_v3, -inf }
 0xdd6   :  { %2833 = vmax.xlane.f32.xlu1 %v2832_v5 }
 0xe34   :  { %v2521_v6 = vpop.f32.mrb[28].mxu0 }
 0xe35   :  { %v2445_v7 = vpop.f32.mrb[26].mxu1  ;;  %v4616_v8 = vpop.f32.mrb[29].mxu0  ;;  %v2522_v12 = vadd.f32 %v2521_v6, %v5387_v24 }
 0xe36   :  { %v2446_v9 = vadd.f32 %v2445_v7, %v5387_v24  ;;  %v4611_v11 = vpop.f32.mrb[27].mxu1 }
 0xe37   :  { %v2838_v19 = vsel %vm404_vm10, %v2522_v12, -inf }
 0xe38   :  { %v2835_v13 = vsel %vm404_vm10, %v2446_v9, -inf }
 0xe39   :  { %2836 = vmax.xlane.f32.xlu0 %v2835_v13  ;;  %v2597_v15 = vpop.f32.mrb[28].mxu1 }
 0xe3a   :  { %v2598_v16 = vadd.f32 %v2597_v15, %v5387_v24  ;;  %v4621_v17 = vpop.f32.mrb[29].mxu1 }
 0xe3c   :  { %v2841_v18 = vsel %vm404_vm10, %v2598_v16, -inf }
 0xe3d   :  { %v2749_v20 = vpop.f32.mrb[30].mxu1  ;;  %2842 = vmax.xlane.f32.xlu1 %v2841_v18  ;;  %2839 = vmax.xlane.f32.xlu0 %v2838_v19  ;;  %v2673_v21 = vpop.f32.mrb[30].mxu0 }
 0xe3e   :  { %v2750_v23 = vadd.f32 %v2749_v20, %v5387_v24  ;;  %v2674_v25 = vadd.f32 %v2673_v21, %v5387_v24  ;;  %v4626_v27 = vpop.f32.mrb[31].mxu0  ;;  %v4631_v29 = vpop.f32.mrb[31].mxu1 }
 0xe40   :  { %v2847_v30 = vsel %vm404_vm10, %v2750_v23, -inf  ;;  %v2844_v61 = vsel %vm404_vm10, %v2674_v25, -inf }
 0xe41   :  { %2848 = vmax.xlane.f32.xlu1 %v2847_v30  ;;  %2845 = vmax.xlane.f32.xlu0 %v2844_v61  ;;  %v2825_v31 = vpop.f32.mrb[32].mxu0 }
 0xe42   :  { %v2826_v1 = vadd.f32 %v2825_v31, %v5387_v24  ;;  %v4636_v32 = vpop.f32.mrb[33].mxu0 }
 0xe44   :  { %v2850_v33 = vsel %vm404_vm10, %v2826_v1, -inf }
 0xe45   :  { %2851 = vmax.xlane.f32.xlu0 %v2850_v33 }
 0xe52   :  { %2917 = vrot.lane.b32.xlu1 %v5607_v47, %s5020_s27 }
 0xe56   :  { %3069 = vrot.lane.b32.xlu1 %v5629_v48, %s5020_s27 }
 0xe5a   :  { %3145 = vrot.lane.b32.xlu1 %v5625_v28, %s5020_s27  ;;  %v2831_v35 = vpop.xlane.xlu0 %2830 }
 0xe5b   :  { %2993 = vrot.lane.b32.xlu0 %v5605_v46, %s5020_s27  ;;  %v2853_v36 = vsub.f32 %v2294_v60, %v2831_v35 }
 0xe5d   :  { %v2861_v38 = vmul.f32 1.442695, %v2853_v36 }
 0xe5e   :  { %3297 = vrot.lane.b32.xlu1 %v5640_v10, %s5020_s27 }
 0xe5f   :  { %3221 = vrot.lane.b32.xlu0 %v5635_v50, %s5020_s27 }
 0xe63   :  { %v2834_v24 = vpop.xlane.xlu1 %2833 }
 0xe64   :  { %v2854_v34 = vsub.f32 %v2370_v3, %v2834_v24 }
 0xe66   :  { %v2863_v37 = vmul.f32 1.442695, %v2854_v34 }
 0xe68   :  { %4939 = vpow2.f32 %v2863_v37 }
 0xe69   :  { %4941 = vpow2.f32 %v2861_v38 }
 0xe72   :  { %v5725_v39 = vpop.eup %4939 }
 0xe73   :  { %v2880_v40 = vsel %vm404_vm10, %v5725_v39, 0.0  ;;  %v5729_v41 = vpop.eup %4941 }
 0xe74   :  { %v2877_v44 = vsel %vm404_vm10, %v5729_v41, 0.0 }
 0xe7e   :  { %2881 = vadd.xlane.f32.xlu0 %v2880_v40 }
 0xe82   :  { %2878 = vadd.xlane.f32.xlu1 %v2877_v44 }
 0xec6   :  { %v2837_v45 = vpop.xlane.xlu0 %2836 }
 0xec7   :  { %v2855_v46 = vsub.f32 %v2446_v9, %v2837_v45 }
 0xec9   :  { %v2865_v26 = vmul.f32 1.442695, %v2855_v46 }
 0xeca   :  { %v2840_v47 = vpop.xlane.xlu0 %2839  ;;  %v2843_v28 = vpop.xlane.xlu1 %2842 }
 0xecb   :  { %4943 = vpow2.f32 %v2865_v26  ;;  %v2856_v48 = vsub.f32 %v2522_v12, %v2840_v47  ;;  %v2857_v50 = vsub.f32 %v2598_v16, %v2843_v28 }
 0xecd   :  { %v2867_v51 = vmul.f32 1.442695, %v2856_v48  ;;  %v2869_v10 = vmul.f32 1.442695, %v2857_v50  ;;  %v2098_v50 = vld [vmem:[%s5961_s2 + $0xc8] sm:$0xff] }
 0xece   :  { %v2846_v52 = vpop.xlane.xlu0 %2845  ;;  %v2849_v53 = vpop.xlane.xlu1 %2848 }
 0xecf   :  { %4945 = vpow2.f32 %v2867_v51  ;;  %v2858_v54 = vsub.f32 %v2674_v25, %v2846_v52  ;;  %v2859_v55 = vsub.f32 %v2750_v23, %v2849_v53  ;;  %v2099_v51 = vld [vmem:[%s5961_s2 + $0xd0] sm:$0xff]  ;;  %v2100_v52 = vld [vmem:[%s5961_s2 + $0xd8] sm:$0xff]  ;;  %v2101_v53 = vld [vmem:[%s5961_s2 + $0xe0] sm:$0xff] }
 0xed0   :  { %4947 = vpow2.f32 %v2869_v10  ;;  %v4830_v10 = vpack.c.bf16 %v2099_v51, %v2098_v50  ;;  %v4243_v50 = vld [vmem:[%s5961_s2 + $0x14a] ss:$0 sm:$0xff] }
 0xed1   :  { %v2871_v56 = vmul.f32 1.442695, %v2858_v54  ;;  %v2873_v57 = vmul.f32 1.442695, %v2859_v55  ;;  %v4834_v54 = vpack.c.bf16 %v2101_v53, %v2100_v52 }
 0xed2   :  { %v2852_v58 = vpop.xlane.xlu0 %2851  ;;  %v2918_v59 = vpop.permute.xlu1 %2917 }
 0xed3   :  { %4949 = vpow2.f32 %v2871_v56  ;;  %v2860_v60 = vsub.f32 %v2826_v1, %v2852_v58  ;;  %4638 = vmatpush3.msra.mxu1 %v2918_v59 }
 0xed4   :  { %4951 = vpow2.f32 %v2873_v57  ;;  %4647 = vmatprep.subr.mxu1 %v5013_v2 }
 0xed5   :  { %v4944_v62 = vpop.eup %4943  ;;  %v2875_v63 = vmul.f32 1.442695, %v2860_v60 }
 0xed6   :  { %v2994_v0 = vpop.permute.xlu0 %2993  ;;  %v2883_v3 = vsel %vm404_vm10, %v4944_v62, 0.0  ;;  %v3070_v16 = vpop.permute.xlu1 %3069 }
 0xed7   :  { %4953 = vpow2.f32 %v2875_v63  ;;  %2884 = vadd.xlane.f32.xlu1 %v2883_v3  ;;  %4643 = vmatpush3.msra.mxu0 %v2994_v0 }
 0xed8   :  { %4652 = vmatprep.subr.mxu0 %v5013_v2 }
 0xed9   :  { %v4946_v4 = vpop.eup %4945 }
 0xeda   :  { %v4948_v5 = vpop.eup %4947  ;;  %v2886_v6 = vsel %vm404_vm10, %v4946_v4, 0.0  ;;  %v3146_v17 = vpop.permute.xlu1 %3145 }
 0xedb   :  { %2887 = vadd.xlane.f32.xlu0 %v2886_v6  ;;  %v2889_v7 = vsel %vm404_vm10, %v4948_v5, 0.0  ;;  %v3222_v18 = vpop.permute.xlu0 %3221 }
 0xedc   :  { %2890 = vadd.xlane.f32.xlu1 %v2889_v7 }
 0xedd   :  { %v4950_v8 = vpop.eup %4949 }
 0xede   :  { %v4952_v9 = vpop.eup %4951  ;;  %v2892_v11 = vsel %vm404_vm10, %v4950_v8, 0.0  ;;  %v3298_v19 = vpop.permute.xlu1 %3297 }
 0xedf   :  { %2893 = vadd.xlane.f32.xlu0 %v2892_v11  ;;  %v2895_v12 = vsel %vm404_vm10, %v4952_v9, 0.0 }
 0xee0   :  { %2896 = vadd.xlane.f32.xlu1 %v2895_v12 }
 0xee1   :  { %v5740_v13 = vpop.eup %4953 }
 0xee2   :  { %v2898_v15 = vsel %vm404_vm10, %v5740_v13, 0.0 }
 0xee3   :  { %2899 = vadd.xlane.f32.xlu0 %v2898_v15 }
 0xef1   :  { %3449 = vrot.lane.b32.xlu1 %v5649_v14, %s5020_s27 }
 0xef9   :  { %3373 = vrot.lane.b32.xlu0 %v5633_v49, %s5020_s27 }
 0xf0b   :  { %v2882_v20 = vpop.xlane.xlu0 %2881 }
 0xf0c   :  { %4955 = vrcp.f32 %v2882_v20  ;;  %v4240_v20 = vld [vmem:[%s5961_s2 + $0x149] ss:$0 sm:$0xff] }
 0xf0f   :  { %v2879_v21 = vpop.xlane.xlu1 %2878 }
 0xf10   :  { %4957 = vrcp.f32 %v2879_v21 }
 0xf16   :  { %v4956_v23 = vpop.eup %4955 }
 0xf17   :  { %v2904_v25 = vmul.f32 %v4956_v23, %v5725_v39 }
 0xf19   :  { %4645 = vmatmul.mubr.msk.f32.vlgmr.msra.gmra.mrb[34].mxu0 %vm404_vm10, %v2904_v25 }
 0xf1a   :  { %v4958_v27 = vpop.eup %4957  ;;  %4653 = vmatpush3.msra.mxu0 %v3146_v17  ;;  %4654 = vmatprep.mubr.msk.f32.mxu0 %vm5014_vm9, %v5013_v2 }
 0xf1b   :  { %v2902_v49 = vmul.f32 %v4958_v27, %v5729_v41  ;;  %4662 = vmatprep.subr.mxu0 %v5013_v2 }
 0xf1d   :  { %4640 = vmatmul.mubr.msk.f32.vlgmr.msra.gmra.mrb[32].mxu1 %vm404_vm10, %v2902_v49 }
 0xf1e   :  { %4648 = vmatpush3.msra.mxu1 %v3070_v16  ;;  %4649 = vmatprep.mubr.msk.f32.mxu1 %vm5014_vm9, %v5013_v2 }
 0xf1f   :  { %4657 = vmatprep.subr.mxu1 %v5013_v2 }
 0xf64   :  { %v2885_v14 = vpop.xlane.xlu1 %2884 }
 0xf65   :  { %4959 = vrcp.f32 %v2885_v14 }
 0xf68   :  { %v2888_v29 = vpop.xlane.xlu0 %2887 }
 0xf69   :  { %4961 = vrcp.f32 %v2888_v29  ;;  %v2891_v30 = vpop.xlane.xlu1 %2890 }
 0xf6a   :  { %4963 = vrcp.f32 %v2891_v30 }
 0xf6c   :  { %v2894_v61 = vpop.xlane.xlu0 %2893 }
 0xf6d   :  { %4965 = vrcp.f32 %v2894_v61  ;;  %v2897_v31 = vpop.xlane.xlu1 %2896 }
 0xf6e   :  { %4967 = vrcp.f32 %v2897_v31 }
 0xf6f   :  { %v4960_v1 = vpop.eup %4959 }
 0xf70   :  { %v2906_v32 = vmul.f32 %v4960_v1, %v4944_v62  ;;  %v2900_v33 = vpop.xlane.xlu0 %2899 }
 0xf71   :  { %4969 = vrcp.f32 %v2900_v33  ;;  %v3450_v44 = vpop.permute.xlu1 %3449 }
 0xf72   :  { %4650 = vmatmul.mubr.msk.f32.vlgmr.msra.gmra.mrb[34].mxu1 %vm404_vm10, %v2906_v32 }
 0xf73   :  { %v4962_v24 = vpop.eup %4961  ;;  %4658 = vmatpush3.msra.mxu1 %v3222_v18  ;;  %4659 = vmatprep.mubr.msk.f32.mxu1 %vm5014_vm9, %v5013_v2 }
 0xf74   :  { %v4964_v34 = vpop.eup %4963  ;;  %v2908_v35 = vmul.f32 %v4962_v24, %v4946_v4  ;;  %4667 = vmatprep.subr.mxu1 %v5013_v2  ;;  %v3374_v37 = vpop.permute.xlu0 %3373 }
 0xf75   :  { %v2910_v36 = vmul.f32 %v4964_v34, %v4948_v5 }
 0xf76   :  { %4655 = vmatmul.mubr.msk.f32.vlgmr.msra.gmra.mrb[36].mxu0 %vm404_vm10, %v2908_v35 }
 0xf77   :  { %v4966_v38 = vpop.eup %4965  ;;  %4660 = vmatmul.mubr.msk.f32.vlgmr.msra.gmra.mrb[36].mxu1 %vm404_vm10, %v2910_v36  ;;  %4663 = vmatpush3.msra.mxu0 %v3298_v19  ;;  %v2102_v36 = vld [vmem:[%s5961_s2 + $0xe8] sm:$0xff] }
 0xf78   :  { %v4968_v39 = vpop.eup %4967  ;;  %v2912_v40 = vmul.f32 %v4966_v38, %v4950_v8  ;;  %4668 = vmatpush3.msra.mxu1 %v3374_v37  ;;  %4664 = vmatprep.mubr.msk.f32.mxu0 %vm5014_vm9, %v5013_v2  ;;  %v2103_v37 = vld [vmem:[%s5961_s2 + $0xf0] sm:$0xff] }
 0xf79   :  { %v2914_v41 = vmul.f32 %v4968_v39, %v4952_v9  ;;  %4669 = vmatprep.mubr.msk.f32.mxu1 %vm5014_vm9, %v5013_v2  ;;  %4672 = vmatprep.subr.mxu0 %v5013_v2  ;;  %v4838_v38 = vpack.c.bf16 %v2103_v37, %v2102_v36  ;;  %v2104_v39 = vld [vmem:[%s5961_s2 + $0xf8] sm:$0xff] }
 0xf7a   :  { %4665 = vmatmul.mubr.msk.f32.vlgmr.msra.gmra.mrb[38].mxu0 %vm404_vm10, %v2912_v40  ;;  %4831 = vmatprep.subr.bf16.mxu1 %v4830_v10  ;;  %v2105_v40 = vld [vmem:[%s5961_s2 + $0x100] sm:$0xff] }
 0xf7b   :  { %v4970_v45 = vpop.eup %4969  ;;  %4670 = vmatmul.mubr.msk.f32.vlgmr.msra.gmra.mrb[38].mxu1 %vm404_vm10, %v2914_v41  ;;  %4673 = vmatpush3.msra.mxu0 %v3450_v44  ;;  %v4842_v41 = vpack.c.bf16 %v2105_v40, %v2104_v39 }
 0xf7c   :  { %v2916_v46 = vmul.f32 %v4970_v45, %v5740_v13  ;;  %4674 = vmatprep.mubr.msk.f32.mxu0 %vm5014_vm9, %v5013_v2  ;;  %4833 = vmatpush3.bf16.msra.mxu1 %v4830_v10  ;;  %v4244_v10 = vld [vmem:[%s5961_s2 + $0x14b] ss:$0 sm:$0xff] }
 0xf7d   :  { %4835 = vmatprep.subr.bf16.mxu1 %v4834_v54  ;;  %4839 = vmatprep.subr.bf16.mxu0 %v4838_v38 }
 0xf7e   :  { %4675 = vmatmul.mubr.msk.f32.vlgmr.msra.gmra.mrb[40].mxu0 %vm404_vm10, %v2916_v46 }
 0xf7f   :  { %4841 = vmatpush3.bf16.msra.mxu0 %v4838_v38 }
 0xf80   :  { %4837 = vmatpush3.bf16.msra.mxu1 %v4834_v54  ;;  %4843 = vmatprep.subr.bf16.mxu0 %v4842_v41 }
 0xf83   :  { %4845 = vmatpush3.bf16.msra.mxu0 %v4842_v41 }
 0xfec   :  { %v3065_v26 = vpop.f32.mrb[34].mxu0 }
 0xfed   :  { %v4646_v47 = vpop.f32.mrb[35].mxu0 }
 0xff0   :  { %v2989_v28 = vpop.f32.mrb[32].mxu1 }
 0xff1   :  { %v4641_v48 = vpop.f32.mrb[33].mxu1 }
0x1045   :  { %v3141_v55 = vpop.f32.mrb[34].mxu1 }
0x1046   :  { %3527 = vrot.lane.b32.xlu0 %v3141_v55, %s5021_s9  ;;  %v4651_v56 = vpop.f32.mrb[35].mxu1 }
0x1049   :  { %v3217_v57 = vpop.f32.mrb[36].mxu0 }
0x104a   :  { %v3293_v58 = vpop.f32.mrb[36].mxu1  ;;  %3529 = vrot.lane.b32.xlu1 %v3217_v57, %s5021_s9  ;;  %v4656_v59 = vpop.f32.mrb[37].mxu0 }
0x104b   :  { %3535 = vrot.lane.b32.xlu0 %v3293_v58, %s5022_s10  ;;  %v4661_v60 = vpop.f32.mrb[37].mxu1 }
0x104c   :  { %v2106_v60 = vld [vmem:[%s5961_s2 + $0x108] sm:$0xff] }
0x104d   :  { %v3369_v62 = vpop.f32.mrb[38].mxu0 }
0x104e   :  { %v3445_v63 = vpop.f32.mrb[38].mxu1  ;;  %3537 = vrot.lane.b32.xlu1 %v3369_v62, %s5022_s10  ;;  %v4666_v0 = vpop.f32.mrb[39].mxu0  ;;  %v2108_v62 = vld [vmem:[%s5961_s2 + $0x118] sm:$0xff] }
0x104f   :  { %3543 = vrot.lane.b32.xlu0 %v3445_v63, %s5023_s11  ;;  %v4671_v3 = vpop.f32.mrb[39].mxu1 }
0x1050   :  { %v2110_v3 = vld [vmem:[%s5961_s2 + $0x128] sm:$0xff] }
0x1051   :  { %v3521_v4 = vpop.f32.mrb[40].mxu0 }
0x1052   :  { %3545 = vrot.lane.b32.xlu1 %v3521_v4, %s5023_s11  ;;  %v4676_v5 = vpop.f32.mrb[41].mxu0  ;;  %v2111_v4 = vld [vmem:[%s5961_s2 + $0x130] sm:$0xff] }
0x1053   :  { %v4854_v5 = vpack.c.bf16 %v2111_v4, %v2110_v3 }
0x10b8   :  { %v3528_v6 = vpop.permute.xlu0 %3527 }
0x10b9   :  { %v3549_v9 = vsel %vm404_vm10, %v2989_v28, %v3528_v6  ;;  %v2112_v6 = vld [vmem:[%s5961_s2 + $0x138] sm:$0xff] }
0x10bc   :  { %v3530_v7 = vpop.permute.xlu1 %3529 }
0x10bd   :  { %v3536_v8 = vpop.permute.xlu0 %3535  ;;  %v3550_v16 = vsel %vm404_vm10, %v3065_v26, %v3530_v7  ;;  %v2113_v7 = vld [vmem:[%s5961_s2 + $0x140] sm:$0xff] }
0x10be   :  { %v3551_v12 = vsel %vm1733_vm12, %v3549_v9, %v3536_v8  ;;  %v4858_v8 = vpack.c.bf16 %v2113_v7, %v2112_v6  ;;  %v4245_v9 = vld [vmem:[%s5961_s2 + $0x14c] ss:$0 sm:$0xff] }
0x10c0   :  { %v3538_v11 = vpop.permute.xlu1 %3537 }
0x10c1   :  { %v3544_v13 = vpop.permute.xlu0 %3543  ;;  %v3552_v17 = vsel %vm1733_vm12, %v3550_v16, %v3538_v11 }
0x10c2   :  { %v3553_v15 = vsel %vm1736_vm13, %v3551_v12, %v3544_v13 }
0x10c3   :  { %4685 = vmatprep.mubr.msk.f32.mxu1 %vm306_vm8, %v3553_v15 }
0x10c4   :  { %v3546_v18 = vpop.permute.xlu1 %3545 }
0x10c5   :  { %v3554_v19 = vsel %vm1736_vm13, %v3552_v17, %v3546_v18 }
0x10c6   :  { %4686 = vmatmul.mubr.msk.f32.vlgmr.msra.gmra.mrb[40].mxu1 %vm306_vm8, %v3554_v19 }
0x1199   :  { %v4687_v21 = vpop.f32.mrb[40].mxu1 }
0x119a   :  { %v3637_v23 = vadd.f32 %v4687_v21, %v4240_v20  ;;  %v3631_v25 = vpop.f32.mrb[41].mxu1 }
0x119b   :  { %v3632_v27 = vadd.f32 %v4240_v20, %v3631_v25 }
0x119c   :  { %v3643_v49 = vsel %vm306_vm8, %v3637_v23, 0.0 }
0x119d   :  { %3644 = vadd.xlane.f32.xlu1 %v3643_v49  ;;  %v3640_v14 = vsel %vm306_vm8, %v3632_v27, 0.0 }
0x119e   :  { %3641 = vadd.xlane.f32.xlu0 %v3640_v14 }
0x122a   :  { %v3645_v29 = vpop.xlane.xlu1 %3644 }
0x122b   :  { %v3647_v30 = vmul.f32 0.03125, %v3645_v29  ;;  %v3642_v61 = vpop.xlane.xlu0 %3641 }
0x122c   :  { %v3646_v31 = vmul.f32 0.03125, %v3642_v61 }
0x122d   :  { %v3649_v1 = vsub.f32 %v3637_v23, %v3647_v30 }
0x122e   :  { %v3648_v32 = vsub.f32 %v3632_v27, %v3646_v31 }
0x122f   :  { %v3651_v34 = vmul.f32 %v3649_v1, %v3649_v1 }
0x1230   :  { %v3650_v33 = vmul.f32 %v3648_v32, %v3648_v32 }
0x1231   :  { %v3655_v35 = vsel %vm306_vm8, %v3651_v34, 0.0 }
0x1232   :  { %v3652_v24 = vsel %vm306_vm8, %v3650_v33, 0.0 }
0x1233   :  { %3653 = vadd.xlane.f32.xlu0 %v3652_v24  ;;  %v4248_v24 = vld [vmem:[%s5961_s2 + $0x14d] ss:$0 sm:$0xff] }
0x1237   :  { %3656 = vadd.xlane.f32.xlu0 %v3655_v35 }
0x12c0   :  { %v3654_v44 = vpop.xlane.xlu0 %3653 }
0x12c1   :  { %v3658_v45 = vmul.f32 0.03125, %v3654_v44 }
0x12c3   :  { %v3660_v46 = vadd.f32 1e-05, %v3658_v45 }
0x12c4   :  { %v3657_v26 = vpop.xlane.xlu0 %3656 }
0x12c5   :  { %4971 = vrsqrt.f32 %v3660_v46  ;;  %v3659_v47 = vmul.f32 0.03125, %v3657_v26 }
0x12c7   :  { %v3661_v28 = vadd.f32 1e-05, %v3659_v47 }
0x12c9   :  { %4973 = vrsqrt.f32 %v3661_v28 }
0x12cf   :  { %v4972_v48 = vpop.eup %4971 }
0x12d0   :  { %v3664_v51 = vmul.f32 %v4972_v48, %v3648_v32 }
0x12d2   :  { %v3670_v52 = vmul.f32 %v4243_v50, %v3664_v51 }
0x12d3   :  { %v4974_v53 = vpop.eup %4973 }
0x12d4   :  { %v3665_v54 = vmul.f32 %v4974_v53, %v3649_v1  ;;  %v3676_v55 = vadd.f32 %v4244_v10, %v3670_v52 }
0x12d6   :  { %v3671_v56 = vmul.f32 %v4243_v50, %v3665_v54  ;;  %v5827_v57 = vadd.f32 %v3676_v55, %v5591_v42  ;;  %v2107_v42 = vld [vmem:[%s5961_s2 + $0x110] sm:$0xff] }
0x12d7   :  { %v4846_v63 = vpack.c.bf16 %v2107_v42, %v2106_v60 }
0x12d8   :  { %v3677_v58 = vadd.f32 %v4244_v10, %v3671_v56  ;;  %4696 = vmatprep.mubr.msk.f32.mxu0 %vm306_vm8, %v5827_v57 }
0x12d9   :  { %4847 = vmatprep.subr.bf16.mxu1 %v4846_v63 }
0x12da   :  { %v5832_v59 = vadd.f32 %v3677_v58, %v5594_v43  ;;  %v2109_v43 = vld [vmem:[%s5961_s2 + $0x120] sm:$0xff]  ;;  %4849 = vmatpush3.bf16.msra.mxu1 %v4846_v63  ;;  %v4251_v58 = vld [vmem:[%s5961_s2 + $0x14e] ss:$0 sm:$0xff] }
0x12db   :  { %v4850_v0 = vpack.c.bf16 %v2109_v43, %v2108_v62  ;;  %v4252_v62 = vld [vmem:[%s5961_s2 + $0x14f] ss:$0 sm:$0xff] }
0x12dc   :  { %4697 = vmatmul.mubr.msk.f32.vlgmr.msra.gmra.mrb[42].mxu0 %vm306_vm8, %v5832_v59 }
0x12dd   :  { %4043 = vmatprep.mubr.f32.mxu0 %v5013_v2  ;;  %4851 = vmatprep.subr.bf16.mxu1 %v4850_v0 }
0x12de   :  { %4853 = vmatpush3.bf16.msra.mxu1 %v4850_v0 }
0x12df   :  { %4855 = vmatprep.subr.bf16.mxu1 %v4854_v5 }
0x12e2   :  { %4857 = vmatpush3.bf16.msra.mxu1 %v4854_v5 }
0x12e3   :  { %4859 = vmatprep.subr.bf16.mxu1 %v4858_v8 }
0x12e6   :  { %4861 = vmatpush3.bf16.msra.mxu1 %v4858_v8 }
0x13af   :  { %v4698_v11 = vpop.f32.mrb[42].mxu0 }
0x13b0   :  { %v3762_v12 = vadd.f32 %v4698_v11, %v4245_v9  ;;  %v3756_v13 = vpop.f32.mrb[43].mxu0 }
0x13b1   :  { %v3757_v15 = vadd.f32 %v4245_v9, %v3756_v13 }
0x13b2   :  { %v3768_v16 = vmul.f32 0.044715, %v3762_v12  ;;  %v3766_v1 = vmul.f32 0.5, %v3762_v12 }
0x13b3   :  { %v3767_v17 = vmul.f32 0.044715, %v3757_v15  ;;  %v3765_v61 = vmul.f32 0.5, %v3757_v15 }
0x13b4   :  { %v3770_v18 = vmul.f32 %v3768_v16, %v3762_v12 }
0x13b5   :  { %v3769_v19 = vmul.f32 %v3767_v17, %v3757_v15 }
0x13b6   :  { %v3772_v20 = vmul.f32 %v3770_v18, %v3762_v12 }
0x13b7   :  { %v3771_v21 = vmul.f32 %v3769_v19, %v3757_v15 }
0x13b8   :  { %v3774_v23 = vadd.f32 %v3772_v20, %v3762_v12  ;;  %v3939_v20 = vld [vmem:[%s5962_s3 + $0x28] sm:$0xff] }
0x13b9   :  { %v3773_v25 = vadd.f32 %v3771_v21, %v3757_v15 }
0x13ba   :  { %v3776_v27 = vmul.f32 0.7978846, %v3774_v23  ;;  %v3934_v23 = vld [vmem:[%s5962_s3] sm:$0xff] }
0x13bb   :  { %v3775_v49 = vmul.f32 0.7978846, %v3773_v25  ;;  %v3938_v25 = vld [vmem:[%s5962_s3 + $0x20] sm:$0xff] }
0x13bc   :  { %4975 = vtanh.f32 %v3776_v27  ;;  %v4864_v27 = vpack.c.bf16 %v3938_v25, %v3934_v23 }
0x13bd   :  { %4977 = vtanh.f32 %v3775_v49  ;;  %v3943_v49 = vld [vmem:[%s5962_s3 + $0x48] sm:$0xff] }
0x13c6   :  { %v4976_v14 = vpop.eup %4975 }
0x13c7   :  { %v4978_v29 = vpop.eup %4977  ;;  %v3780_v30 = vadd.f32 1.0, %v4976_v14  ;;  %v3947_v14 = vld [vmem:[%s5962_s3 + $0x68] sm:$0xff] }
0x13c8   :  { %v3779_v31 = vadd.f32 1.0, %v4978_v29  ;;  %v4866_v29 = vpack.c.bf16 %v3947_v14, %v3943_v49 }
0x13c9   :  { %v3782_v33 = vmul.f32 %v3780_v30, %v3766_v1  ;;  %v3942_v30 = vld [vmem:[%s5962_s3 + $0x40] sm:$0xff]  ;;  %v3937_v1 = vld [vmem:[%s5962_s3 + $0x18] sm:$0xff] }
0x13ca   :  { %v3781_v32 = vmul.f32 %v3779_v31, %v3765_v61  ;;  %v3946_v61 = vld [vmem:[%s5962_s3 + $0x60] sm:$0xff] }
0x13cb   :  { %v4868_v31 = vpack.c.bf16 %v3946_v61, %v3942_v30 }
0x13cc   :  { %4715 = vmatprep.mubr.msk.f32.mxu1 %vm1972_vm14, %v3781_v32  ;;  %v3941_v32 = vld [vmem:[%s5962_s3 + $0x38] sm:$0xff] }
0x13cd   :  { %4716 = vmatmul.mubr.msk.f32.vlgmr.msra.gmra.mrb[42].mxu1 %vm1972_vm14, %v3782_v33  ;;  %v4870_v33 = vpack.c.bf16 %v3941_v32, %v3937_v1 }
0x14a0   :  { %v4717_v34 = vpop.f32.mrb[42].mxu1 }
0x14a1   :  { %v3865_v35 = vadd.f32 %v4717_v34, %v4248_v24  ;;  %v3859_v36 = vpop.f32.mrb[43].mxu1 }
0x14a2   :  { %v3860_v37 = vadd.f32 %v4248_v24, %v3859_v36 }
0x14a3   :  { %v3871_v38 = vsel %vm306_vm8, %v3865_v35, 0.0 }
0x14a4   :  { %3872 = vadd.xlane.f32.xlu0 %v3871_v38  ;;  %v3868_v39 = vsel %vm306_vm8, %v3860_v37, 0.0 }
0x14a5   :  { %3869 = vadd.xlane.f32.xlu1 %v3868_v39  ;;  %v3936_v39 = vld [vmem:[%s5962_s3 + $0x10] sm:$0xff] }
0x1531   :  { %v3873_v40 = vpop.xlane.xlu0 %3872 }
0x1532   :  { %v3875_v41 = vmul.f32 0.03125, %v3873_v40  ;;  %v3870_v44 = vpop.xlane.xlu1 %3869  ;;  %v3940_v40 = vld [vmem:[%s5962_s3 + $0x30] sm:$0xff] }
0x1533   :  { %v3874_v45 = vmul.f32 0.03125, %v3870_v44  ;;  %v3949_v44 = vld [vmem:[%s5962_s3 + $0x78] sm:$0xff] }
0x1534   :  { %v3877_v46 = vsub.f32 %v3865_v35, %v3875_v41  ;;  %v3945_v41 = vld [vmem:[%s5962_s3 + $0x58] sm:$0xff] }
0x1535   :  { %v3876_v26 = vsub.f32 %v3860_v37, %v3874_v45 }
0x1536   :  { %v3879_v47 = vmul.f32 %v3877_v46, %v3877_v46 }
0x1537   :  { %v3878_v28 = vmul.f32 %v3876_v26, %v3876_v26 }
0x1538   :  { %v3883_v48 = vsel %vm306_vm8, %v3879_v47, 0.0  ;;  %v4874_v47 = vpack.c.bf16 %v3949_v44, %v3945_v41 }
0x1539   :  { %3884 = vadd.xlane.f32.xlu0 %v3883_v48  ;;  %v3880_v50 = vsel %vm306_vm8, %v3878_v28, 0.0  ;;  %v3944_v28 = vld [vmem:[%s5962_s3 + $0x50] sm:$0xff] }
0x153a   :  { %3881 = vadd.xlane.f32.xlu1 %v3880_v50  ;;  %v3948_v48 = vld [vmem:[%s5962_s3 + $0x70] sm:$0xff] }
0x15c6   :  { %v3885_v51 = vpop.xlane.xlu0 %3884 }
0x15c7   :  { %v3887_v10 = vmul.f32 0.03125, %v3885_v51  ;;  %v3882_v52 = vpop.xlane.xlu1 %3881  ;;  %v4876_v51 = vpack.c.bf16 %v3948_v48, %v3944_v28 }
0x15c8   :  { %v3886_v53 = vmul.f32 0.03125, %v3882_v52  ;;  %v3955_v52 = vsub.s32 0, %v5383_v22 }
0x15c9   :  { %v3889_v54 = vadd.f32 1e-05, %v3887_v10 }
0x15ca   :  { %v3888_v55 = vadd.f32 1e-05, %v3886_v53  ;;  %v4253_v53 = vld [vmem:[%s5962_s3 + $0x80] ss:$8 sm:$0xf] }
0x15cb   :  { %4979 = vrsqrt.f32 %v3889_v54  ;;  %v3959_v54 = vsub.s32 1, %v5383_v22 }
0x15cc   :  { %4981 = vrsqrt.f32 %v3888_v55  ;;  %v3956_v55 = vrot.slane %v4253_v53, %v3955_v52 }
0x15d5   :  { %v4980_v56 = vpop.eup %4979 }
0x15d6   :  { %v4982_v60 = vpop.eup %4981  ;;  %v3893_v42 = vmul.f32 %v4980_v56, %v3877_v46  ;;  %v4872_v46 = vpack.c.bf16 %v3940_v40, %v3936_v39  ;;  %v3960_v56 = vrot.slane %v4253_v53, %v3959_v54 }
0x15d7   :  { %v3892_v63 = vmul.f32 %v4982_v60, %v3876_v26 }
0x15d8   :  { %v3899_v43 = vmul.f32 %v4251_v58, %v3893_v42 }
0x15d9   :  { %v3898_v0 = vmul.f32 %v4251_v58, %v3892_v63 }
0x15da   :  { %v3905_v3 = vadd.f32 %v4252_v62, %v3899_v43 }
0x15db   :  { %v3904_v4 = vadd.f32 %v4252_v62, %v3898_v0  ;;  %v3963_v62 = vsub.s32 2, %v5383_v22 }
0x15dc   :  { %v3907_v5 = vadd.f32 %v3905_v3, %v5832_v59 }
0x15dd   :  { %v3906_v6 = vadd.f32 %v3904_v4, %v5827_v57  ;;  %v3935_v57 = vld [vmem:[%s5962_s3 + $0x8] sm:$0xff]  ;;  %v3964_v4 = vrot.slane %v4253_v53, %v3963_v62  ;;  %s5024_s3 = smov [#allocation2]  }
0x15de   :  { %v3911_v7 = vsel %vm306_vm8, %v3907_v5, 0.0  ;;  %v4862_v21 = vpack.c.bf16 %v3939_v20, %v3935_v57  ;;  %s4146_s14 = sshll.u32 %s5024_s3, 4  ;;  %s4147_s14 = int_to_ptr.vmem [resolvable:$true] %s4146_s14 }
0x15df   :  { %3912 = vadd.xlane.f32.xlu0 %v3911_v7  ;;  %v3908_v8 = vsel %vm306_vm8, %v3906_v6, 0.0  ;;  %s4987_s15 = scalar_lea.vmem %s4147_s14, 1024  ;;  %p4992_p1 = scmp.lt.s32.totalorder %s4147_s14, %s4147_s14 }
0x15e0   :  { %3909 = vadd.xlane.f32.xlu1 %v3908_v8  ;;  %4863 = vmatprep.subr.bf16.mxu0 %v4862_v21  ;;  %p4988_p0 = scmp.ne.s32.totalorder %s4147_s14, %s4987_s15  ;;  %p4993_p2 = scmp.lt.s32.totalorder %s4987_s15, %s4987_s15 }
0x15e1   :  { %4865 = vmatpush1.bf16.msra.mxu0 %v4864_v27 }
0x15e2   :  { %4867 = vmatprep.subr.bf16.mxu0 %v4866_v29  ;;  %p4994_p3 = por %p4993_p2, %p4992_p1 }
0x15e4   :  { %p4995_p4 = pnand %p4994_p3, %p4988_p0 }
0x15e5   :  { %4869 = vmatpush1.bf16.msra.mxu0 %v4868_v31 }
0x15e6   :  { %4871 = vmatprep.subr.bf16.mxu0 %v4870_v33 }
0x166c   :  { %v3913_v9 = vpop.xlane.xlu0 %3912 }
0x166d   :  { %v3915_v11 = vmul.f32 0.03125, %v3913_v9  ;;  %v3910_v12 = vpop.xlane.xlu1 %3909 }
0x166e   :  { %v3914_v13 = vmul.f32 0.03125, %v3910_v12 }
0x166f   :  { %v3917_v15 = vsub.f32 %v3907_v5, %v3915_v11 }
0x1670   :  { %v3916_v16 = vsub.f32 %v3906_v6, %v3914_v13 }
0x1671   :  { %v3919_v17 = vmul.f32 %v3917_v15, %v3917_v15 }
0x1672   :  { %v3918_v18 = vmul.f32 %v3916_v16, %v3916_v16 }
0x1673   :  { %v3923_v19 = vsel %vm306_vm8, %v3919_v17, 0.0 }
0x1674   :  { %3924 = vadd.xlane.f32.xlu0 %v3923_v19  ;;  %v3920_v59 = vsel %vm306_vm8, %v3918_v18, 0.0 }
0x1675   :  { %3921 = vadd.xlane.f32.xlu1 %v3920_v59 }
0x1701   :  { %v3925_v24 = vpop.xlane.xlu0 %3924 }
0x1702   :  { %v3927_v34 = vmul.f32 0.03125, %v3925_v24  ;;  %v3922_v35 = vpop.xlane.xlu1 %3921 }
0x1703   :  { %v3926_v36 = vmul.f32 0.03125, %v3922_v35 }
0x1704   :  { %v3929_v37 = vadd.f32 1e-05, %v3927_v34 }
0x1705   :  { %v3928_v38 = vadd.f32 1e-05, %v3926_v36 }
0x1707   :  { %4983 = vrsqrt.f32 %v3928_v38 }
0x1708   :  { %4985 = vrsqrt.f32 %v3929_v37 }
0x1711   :  { %v4984_v45 = vpop.eup %4983 }
0x1712   :  { %v3932_v26 = vmul.f32 %v4984_v45, %v3916_v16  ;;  %v4986_v50 = vpop.eup %4985 }
0x1713   :  { %v3933_v10 = vmul.f32 %v4986_v50, %v3917_v15 }
0x1714   :  { %4254 = vmatmul.mubr.msk.f32.vlgmr.msra.gmra.mrb[44].mxu0 %vm306_vm8, %v3932_v26 }
0x1715   :  { %4873 = vmatpush1.bf16.msra.mxu0 %v4872_v46  ;;  %4049 = vmatprep.mubr.f32.mxu0 %v5013_v2 }
0x1716   :  { %4875 = vmatprep.subr.bf16.mxu0 %v4874_v47 }
0x1718   :  { %4255 = vmatmul.mubr.msk.f32.gmra.mrb[46].mxu0 %vm306_vm8, %v3933_v10 }
0x1719   :  { %4877 = vmatpush1.bf16.msra.mxu0 %v4876_v51  ;;  %4120 = vmatprep.mubr.f32.mxu0 %v5013_v2 }
0x171c   :  { %4256 = vmatmul.mubr.msk.f32.vlgmr.msra.gmra.mrb[48].mxu0 %vm306_vm8, %v3932_v26 }
0x171d   :  { %4126 = vmatprep.mubr.f32.mxu0 %v5013_v2  ;;  %v3967_v2 = vsub.s32 3, %v5383_v22 }
0x171f   :  { %v3968_v6 = vrot.slane %v4253_v53, %v3967_v2 }
0x1720   :  { %4257 = vmatmul.mubr.msk.f32.gmra.mrb[50].mxu0 %vm306_vm8, %v3933_v10 }
0x17e7   :  { %v4045_v58 = vpop.f32.mrb[44].mxu0 }
0x17e8   :  { %v4046_v60 = vadd.f32 %v4045_v58, %v3956_v55  ;;  %v4047_v42 = vpop.f32.mrb[45].mxu0 }
0x17e9   :  { %v4048_v63 = vadd.f32 %v4047_v42, %v3960_v56 }
0x17ea   :  { %4133 = vst [vmem:[#allocation2] sm:$0xff] %v4046_v60 }
0x17eb   :  { %4134 = vst [vmem:[#allocation2 + $0x8] sm:$0xff] %v4048_v63  ;;  %v4051_v43 = vpop.f32.mrb[46].mxu0 }
0x17ec   :  { %v4052_v0 = vadd.f32 %v4051_v43, %v3956_v55  ;;  %v4053_v3 = vpop.f32.mrb[47].mxu0 }
0x17ed   :  { %v4054_v5 = vadd.f32 %v4053_v3, %v3960_v56 }
0x17ee   :  { %4137 = vst [vmem:[#allocation2 + $0x20] sm:$0xff] %v4052_v0 }
0x17ef   :  { %4138 = vst [vmem:[#allocation2 + $0x28] sm:$0xff] %v4054_v5  ;;  %v4122_v7 = vpop.f32.mrb[48].mxu0 }
0x17f0   :  { %v4123_v8 = vadd.f32 %v4122_v7, %v3964_v4  ;;  %v4124_v9 = vpop.f32.mrb[49].mxu0 }
0x17f1   :  { %v4125_v11 = vadd.f32 %v4124_v9, %v3968_v6 }
0x17f2   :  { %4135 = vst [vmem:[#allocation2 + $0x10] sm:$0xff] %v4123_v8 }
0x17f3   :  { %4136 = vst [vmem:[#allocation2 + $0x18] sm:$0xff] %v4125_v11  ;;  %v4128_v12 = vpop.f32.mrb[50].mxu0 }
0x17f4   :  { %v4129_v22 = vadd.f32 %v4128_v12, %v3964_v4  ;;  %v4130_v13 = vpop.f32.mrb[51].mxu0 }
0x17f5   :  { %v4131_v15 = vadd.f32 %v4130_v13, %v3968_v6 }
0x17f6   :  { %4139 = vst [vmem:[#allocation2 + $0x30] sm:$0xff] %v4129_v22 }
0x17f7   :  { %4140 = vst [vmem:[#allocation2 + $0x38] sm:$0xff] %v4131_v15 }
0x17f8   :  { %4998 = shalt.err (!%p4995_p4)
}
0x17f9   :  { %s4999_s18 = scalar_lea.hbm %s5963_s4, 1024 }
0x17fa   :  { %p5000_p5 = scmp.ne.s32.totalorder %s5963_s4, %s4999_s18  ;;  %p5003_p6 = scmp.lt.u32.totalorder %s4999_s18, %s5963_s4 }
0x17fc   :  { %p5005_p7 = pnand %p5003_p6, %p5000_p5 }
0x17fe   :  { %5008 = shalt.err (!%p5005_p7)
}
0x17ff   :  { %s5025_s26 = smov 512   ;;  %s5026_s27 = smov 32  }
0x1800   :  { %4152 = dma.vmem_to_hbm [thread:$0]  %s4147_s14, 1024, %s5963_s4, [#allocation3], %s5025_s26, %s5025_s26, %s5026_s27  }
0x1801   :  { %5009 = dma.done.wait [#allocation3], 1024  }
0x1802   :  { %5010 = vsyncadd [#allocation3], 4294966272 }
0x1803   :  { %4156 = vsyncpa [#allocation3], 1 }

</bundles_post_ra>
